<compile_context>
chip_gen: v7x
topology: tpu7x:2x2x1
jax: 0.10.0
libtpu: 0.0.40
codegen_flags: <defaults>
</compile_context>

<pallas_src>
import jax
import jax.numpy as jnp
from jax.experimental import pallas as pl
from jax.experimental.pallas import tpu as pltpu

HIDDEN = 768          # transformer hidden size / Conv1d in_channels
NUM_FILTERS = 256     # Conv1d out_channels
NUM_CLASSES = 6
KERNEL_SIZE = 3
FC_PAD = 128          # fc output padded to one full lane group (lane-dense stores)
MAX_TILE_B = 512      # batch tile size (raised per perf review)
SPLIT_B = 64          # above this, force >=2 grid steps so v7x's 2nd TensorCore has work


def fused_emotion_kernel(ids_ref,                       # SMEM (B, S) int32  (scalar prefetch)
                         mask_ref,                      # VMEM (tb, S) f32
                         emb_hbm,                       # HBM  (VOCAB, 768) f32 (pl.ANY)
                         pw_ref, pb_ref,                # (768,768) bf16, (1,768) f32
                         wconv_ref, bconv_ref,          # (768,256) bf16, (1,256) f32
                         wfc_ref, bfc_ref,              # (256,128) bf16, (1,128) f32
                         out_ref,                       # (tb, 128) f32
                         ebuf, sem, mean_ref):          # scratch: (S,768) f32, DMA sems, (tb,768) f32
    i = pl.program_id(0)
    B, S = ids_ref.shape
    tb = mean_ref.shape[0]

    if B % tb != 0:
        # Partial last tile: rows >= B never receive a DMA.  Zero the scratch so the
        # head still computes on finite values there (those output rows are discarded).
        mean_ref[...] = jnp.zeros_like(mean_ref)

    # ---- fused embedding gather + masked sum (no (B,S,768) HBM round trip) ------------
    @pl.loop(0, tb)
    def _(r):
        b = i * tb + r

        @pl.when(b < B)
        def _():
            # Issue all S row-gather DMAs for this batch element; the engine overlaps them.
            @pl.loop(0, S)
            def _(s):
                pltpu.make_async_copy(emb_hbm.at[ids_ref[b, s]], ebuf.at[s],
                                      sem.at[s]).start()

            @pl.loop(0, S)
            def _(s):
                pltpu.make_async_copy(emb_hbm.at[0], ebuf.at[s], sem.at[s]).wait()

            # Masked token sum as a tiny (1,S) @ (S,768) MXU matmul.
            mrow = mask_ref[pl.ds(r, 1), :]                                   # (1, S)
            mean_ref[pl.ds(r, 1), :] = jnp.dot(
                mrow, ebuf[...], preferred_element_type=jnp.float32)          # (1, 768)

    # Divide by token counts once, vectorised over the whole tile.
    counts = jnp.maximum(jnp.sum(mask_ref[...], axis=1, keepdims=True), 1.0)  # (tb, 1)
    mean = (mean_ref[...] / counts).astype(jnp.bfloat16)                      # (tb, 768)

    # ---- BERT-style pooler: tanh(mean @ W_p + b_p)  (f32 accumulate / f32 tanh) -------
    pooled = jnp.tanh(
        jnp.dot(mean, pw_ref[...], preferred_element_type=jnp.float32) + pb_ref[...])

    # ---- Conv1d(768->256, k=3, pad=1) on a length-1 signal: center tap only -----------
    conv = jnp.dot(pooled.astype(jnp.bfloat16), wconv_ref[...],
                   preferred_element_type=jnp.float32) + bconv_ref[...]
    conv = jnp.maximum(conv, 0.0)       # F.relu; torch.max over length-1 dim == identity

    # ---- fc into a lane-dense 128-wide padded output (real classes in lanes [:6]) -----
    out_ref[...] = jnp.dot(conv.astype(jnp.bfloat16), wfc_ref[...],
                           preferred_element_type=jnp.float32) + bfc_ref[...]


def prepare_params(raw):
    """One-time weight preprocessing — hoisted out of the per-call path."""
    conv_center = jnp.transpose(
        raw["conv_w"][:, :, KERNEL_SIZE // 2]).astype(jnp.bfloat16)            # (768, 256)
    fc_w_pad = jnp.zeros((NUM_FILTERS, FC_PAD), jnp.bfloat16)
    fc_w_pad = fc_w_pad.at[:, :NUM_CLASSES].set(
        jnp.transpose(raw["fc_w"]).astype(jnp.bfloat16))                       # (256, 128)
    fc_b_pad = jnp.zeros((1, FC_PAD), jnp.float32).at[0, :NUM_CLASSES].set(raw["fc_b"])
    return {
        "emb":           raw["emb"].astype(jnp.float32),                       # (VOCAB, 768)
        "pooler_w":      raw["pooler_w"].astype(jnp.bfloat16),                 # (768, 768)
        "pooler_b":      raw["pooler_b"].reshape(1, HIDDEN).astype(jnp.float32),
        "conv_w_center": conv_center,
        "conv_b":        raw["conv_b"].reshape(1, NUM_FILTERS).astype(jnp.float32),
        "fc_w_pad":      fc_w_pad,
        "fc_b_pad":      fc_b_pad,
    }


def _pick_batch_tile(B):
    """Large tiles to amortize grid-step overhead, but >=2 steps once B > SPLIT_B so
    the 'parallel' batch axis can be sharded across v7x's two TensorCores."""
    if B <= SPLIT_B:
        return B
    n_steps = max(2, -(-B // MAX_TILE_B))
    tb = -(-B // n_steps)
    tb = ((tb + 7) // 8) * 8          # keep tb a multiple of 8 (sublane alignment)
    return min(tb, MAX_TILE_B)


@jax.jit
def emotion_forward(prepped, input_ids, attention_mask):
    """input_ids/attention_mask: (B, S) int32.  Returns logits (B, NUM_CLASSES) f32."""
    B, S = input_ids.shape
    tb = _pick_batch_tile(B)
    grid = (pl.cdiv(B, tb),)
    mask_f32 = attention_mask.astype(jnp.float32)

    out_padded = pl.pallas_call(
        fused_emotion_kernel,
        out_shape=jax.ShapeDtypeStruct((B, FC_PAD), jnp.float32),
        grid_spec=pltpu.PrefetchScalarGridSpec(
            num_scalar_prefetch=1,                                      # input_ids -> SMEM
            grid=grid,
            in_specs=[
                pl.BlockSpec((tb, S), lambda i, ids: (i, 0)),           # attention mask tile
                pl.BlockSpec(memory_space=pl.ANY),                      # embedding table (HBM)
                pl.BlockSpec((HIDDEN, HIDDEN), lambda i, ids: (0, 0)),  # pooler W (VMEM-resident)
                pl.BlockSpec((1, HIDDEN), lambda i, ids: (0, 0)),       # pooler b
                pl.BlockSpec((HIDDEN, NUM_FILTERS), lambda i, ids: (0, 0)),  # conv center tap
                pl.BlockSpec((1, NUM_FILTERS), lambda i, ids: (0, 0)),  # conv b
                pl.BlockSpec((NUM_FILTERS, FC_PAD), lambda i, ids: (0, 0)),  # fc W (padded)
                pl.BlockSpec((1, FC_PAD), lambda i, ids: (0, 0)),       # fc b (padded)
            ],
            out_specs=pl.BlockSpec((tb, FC_PAD), lambda i, ids: (i, 0)),
            scratch_shapes=[
                pltpu.VMEM((S, HIDDEN), jnp.float32),    # per-row embedding gather buffer
                pltpu.SemaphoreType.DMA((S,)),           # one sem per in-flight token row
                pltpu.VMEM((tb, HIDDEN), jnp.float32),   # masked-sum / mean tile
            ],
        ),
        compiler_params=pltpu.CompilerParams(
            dimension_semantics=("parallel",)),
    )(input_ids, mask_f32,
      prepped["emb"],
      prepped["pooler_w"], prepped["pooler_b"],
      prepped["conv_w_center"], prepped["conv_b"],
      prepped["fc_w_pad"], prepped["fc_b_pad"])
    return out_padded[:, :NUM_CLASSES]


# ----------------------------- plain-JAX f32 reference --------------------------------
def reference_forward(raw, input_ids, attention_mask):
    """f32 mirror of the PyTorch semantics (stub transformer + conv head)."""
    emb = raw["emb"][input_ids]                                         # (B, S, 768)
    m = attention_mask[..., None].astype(jnp.float32)
    mean = jnp.sum(emb * m, axis=1) / jnp.maximum(jnp.sum(m, axis=1), 1.0)
    pooled = jnp.tanh(mean @ raw["pooler_w"] + raw["pooler_b"])         # pooler_output
    x = pooled[:, :, None]                                              # (B, 768, 1)
    xp = jnp.pad(x, ((0, 0), (0, 0), (1, 1)))                           # (B, 768, 3)
    conv = jnp.einsum("bck,fck->bf", xp, raw["conv_w"]) + raw["conv_b"]
    conv = jnp.maximum(conv, 0.0)                                       # relu; max(L=1)=id
    return conv @ raw["fc_w"].T + raw["fc_b"]


if __name__ == "__main__":
    key = jax.random.PRNGKey(0)
    k_emb, k_pw, k_pb, k_cw, k_cb, k_fw, k_fb, k_ids, k_mask = jax.random.split(key, 9)

    B, S, VOCAB = 8, 8, 100
    raw = {
        "emb":      0.02 * jax.random.normal(k_emb, (VOCAB, HIDDEN), jnp.float32),
        "pooler_w": 0.02 * jax.random.normal(k_pw, (HIDDEN, HIDDEN), jnp.float32),
        "pooler_b": 0.02 * jax.random.normal(k_pb, (HIDDEN,), jnp.float32),
        "conv_w":   0.02 * jax.random.normal(k_cw, (NUM_FILTERS, HIDDEN, KERNEL_SIZE), jnp.float32),
        "conv_b":   0.02 * jax.random.normal(k_cb, (NUM_FILTERS,), jnp.float32),
        "fc_w":     0.02 * jax.random.normal(k_fw, (NUM_CLASSES, NUM_FILTERS), jnp.float32),
        "fc_b":     0.02 * jax.random.normal(k_fb, (NUM_CLASSES,), jnp.float32),
    }

    input_ids = jax.random.randint(k_ids, (B, S), 0, VOCAB, dtype=jnp.int32)
    attention_mask = (jax.random.uniform(k_mask, (B, S)) > 0.2).astype(jnp.int32)
    attention_mask = attention_mask.at[:, 0].set(1)   # at least one valid token per row

    prepped = prepare_params(raw)                     # one-time, outside the per-call path

    logits = jax.block_until_ready(emotion_forward(prepped, input_ids, attention_mask))
    assert logits.shape == (B, NUM_CLASSES) and logits.dtype == jnp.float32

    ref = reference_forward(raw, input_ids, attention_mask)
    max_err = float(jnp.max(jnp.abs(logits - ref)))
    # Tolerance covers bf16 weight quantization inside the kernel.
    assert jnp.allclose(logits, ref, atol=1e-2, rtol=1e-2), max_err

    print("KERNEL_OK")
</pallas_src>

<mosaic_0001>
module attributes {stable_mosaic.version = 11 : i64} {
  func.func @fused_emotion_kernel(%arg0: i32, %arg1: memref<8x8xi32, #tpu.memory_space<smem>>, %arg2: memref<8x8xf32, #tpu.memory_space<vmem>>, %arg3: memref<100x768xf32, #tpu.memory_space<any>>, %arg4: memref<768x768xbf16, #tpu.memory_space<vmem>>, %arg5: memref<1x768xf32, #tpu.memory_space<vmem>>, %arg6: memref<768x256xbf16, #tpu.memory_space<vmem>>, %arg7: memref<1x256xf32, #tpu.memory_space<vmem>>, %arg8: memref<256x128xbf16, #tpu.memory_space<vmem>>, %arg9: memref<1x128xf32, #tpu.memory_space<vmem>>, %arg10: memref<8x128xf32, #tpu.memory_space<vmem>>, %arg11: memref<8x768xf32, #tpu.memory_space<vmem>>, %arg12: memref<8x!tpu.dma_semaphore, #tpu.memory_space<semaphore_mem>>, %arg13: memref<8x768xf32, #tpu.memory_space<vmem>>) attributes {dimension_semantics = [#tpu.dimension_semantics<parallel>], iteration_bounds = array<i64: 1>, scalar_prefetch = 1 : i64, scratch_operands = 3 : i64, tpu.core_type = #tpu.core_type<tc>, window_params = [{transform_indices = @transform_0, window_bounds = array<i64: 8, 8>}, {}, {pipeline_mode = #tpu.pipeline_mode<synchronous>, transform_indices = @transform_2, window_bounds = array<i64: 768, 768>}, {pipeline_mode = #tpu.pipeline_mode<synchronous>, transform_indices = @transform_3, window_bounds = array<i64: 1, 768>}, {pipeline_mode = #tpu.pipeline_mode<synchronous>, transform_indices = @transform_4, window_bounds = array<i64: 768, 256>}, {pipeline_mode = #tpu.pipeline_mode<synchronous>, transform_indices = @transform_5, window_bounds = array<i64: 1, 256>}, {pipeline_mode = #tpu.pipeline_mode<synchronous>, transform_indices = @transform_6, window_bounds = array<i64: 256, 128>}, {pipeline_mode = #tpu.pipeline_mode<synchronous>, transform_indices = @transform_7, window_bounds = array<i64: 1, 128>}, {transform_indices = @transform_8, window_bounds = array<i64: 8, 128>}]} {
    %c0_i32 = arith.constant 0 : i32
    %c8_i32 = arith.constant 8 : i32
    %0 = arith.addi %c0_i32, %c8_i32 : i32
    %c1_i32 = arith.constant 1 : i32
    scf.for %arg14 = %c0_i32 to %0 step %c1_i32  : i32 {
      %c1_i32_23 = arith.constant 1 : i32
      %31 = arith.muli %arg14, %c1_i32_23 : i32
      %c0_i32_24 = arith.constant 0 : i32
      %32 = arith.addi %c0_i32_24, %31 : i32
      %c8_i32_25 = arith.constant 8 : i32
      %33 = arith.muli %arg0, %c8_i32_25 : i32
      %34 = arith.addi %33, %32 : i32
      %c8_i32_26 = arith.constant 8 : i32
      %35 = arith.cmpi slt, %34, %c8_i32_26 : i32
      %36 = arith.extui %35 : i1 to i32
      %c0_i32_27 = arith.constant 0 : i32
      %37 = arith.cmpi ne, %36, %c0_i32_27 : i32
      scf.if %37 {
        %c0_i32_28 = arith.constant 0 : i32
        %c8_i32_29 = arith.constant 8 : i32
        %38 = arith.addi %c0_i32_28, %c8_i32_29 : i32
        %c1_i32_30 = arith.constant 1 : i32
        scf.for %arg15 = %c0_i32_28 to %38 step %c1_i32_30  : i32 {
          %c1_i32_41 = arith.constant 1 : i32
          %46 = arith.muli %arg15, %c1_i32_41 : i32
          %c0_i32_42 = arith.constant 0 : i32
          %47 = arith.addi %c0_i32_42, %46 : i32
          %48 = arith.index_cast %34 : i32 to index
          %49 = arith.index_cast %47 : i32 to index
          %50 = memref.load %arg1[%48, %49] : memref<8x8xi32, #tpu.memory_space<smem>>
          %c0_i32_43 = arith.constant 0 : i32
          %51 = tpu.memref_slice %arg3[%50, %c0_i32_43] : memref<100x768xf32, #tpu.memory_space<any>> -> memref<1x768xf32, #tpu.memory_space<any>>
          %52 = tpu.memref_squeeze %51 : memref<1x768xf32, #tpu.memory_space<any>> -> memref<768xf32, #tpu.memory_space<any>>
          %c0_i32_44 = arith.constant 0 : i32
          %53 = tpu.memref_slice %arg11[%47, %c0_i32_44] : memref<8x768xf32, #tpu.memory_space<vmem>> -> memref<1x768xf32, #tpu.memory_space<vmem>>
          %54 = tpu.memref_squeeze %53 : memref<1x768xf32, #tpu.memory_space<vmem>> -> memref<768xf32, #tpu.memory_space<vmem>>
          %55 = tpu.memref_slice %arg12[%47] : memref<8x!tpu.dma_semaphore, #tpu.memory_space<semaphore_mem>> -> memref<1x!tpu.dma_semaphore, #tpu.memory_space<semaphore_mem>>
          %56 = tpu.memref_squeeze %55 : memref<1x!tpu.dma_semaphore, #tpu.memory_space<semaphore_mem>> -> memref<!tpu.dma_semaphore, #tpu.memory_space<semaphore_mem>>
          tpu.enqueue_dma source(%52 : memref<768xf32, #tpu.memory_space<any>>) target(%54 : memref<768xf32, #tpu.memory_space<vmem>>) target_semaphore(%56 : memref<!tpu.dma_semaphore, #tpu.memory_space<semaphore_mem>>)
        }
        %c8_i32_31 = arith.constant 8 : i32
        %c0_i32_32 = arith.constant 0 : i32
        %c8_i32_33 = arith.constant 8 : i32
        %39 = arith.addi %c0_i32_32, %c8_i32_33 : i32
        %c1_i32_34 = arith.constant 1 : i32
        scf.for %arg15 = %c0_i32_32 to %39 step %c1_i32_34  : i32 {
          %c1_i32_41 = arith.constant 1 : i32
          %46 = arith.muli %arg15, %c1_i32_41 : i32
          %c0_i32_42 = arith.constant 0 : i32
          %47 = arith.addi %c0_i32_42, %46 : i32
          %c0_i32_43 = arith.constant 0 : i32
          %c0_i32_44 = arith.constant 0 : i32
          %48 = tpu.memref_slice %arg3[%c0_i32_43, %c0_i32_44] : memref<100x768xf32, #tpu.memory_space<any>> -> memref<1x768xf32, #tpu.memory_space<any>>
          %49 = tpu.memref_squeeze %48 : memref<1x768xf32, #tpu.memory_space<any>> -> memref<768xf32, #tpu.memory_space<any>>
          %c0_i32_45 = arith.constant 0 : i32
          %50 = tpu.memref_slice %arg11[%47, %c0_i32_45] : memref<8x768xf32, #tpu.memory_space<vmem>> -> memref<1x768xf32, #tpu.memory_space<vmem>>
          %51 = tpu.memref_squeeze %50 : memref<1x768xf32, #tpu.memory_space<vmem>> -> memref<768xf32, #tpu.memory_space<vmem>>
          %52 = tpu.memref_slice %arg12[%47] : memref<8x!tpu.dma_semaphore, #tpu.memory_space<semaphore_mem>> -> memref<1x!tpu.dma_semaphore, #tpu.memory_space<semaphore_mem>>
          %53 = tpu.memref_squeeze %52 : memref<1x!tpu.dma_semaphore, #tpu.memory_space<semaphore_mem>> -> memref<!tpu.dma_semaphore, #tpu.memory_space<semaphore_mem>>
          tpu.wait_dma2 semaphore(%53 : memref<!tpu.dma_semaphore, #tpu.memory_space<semaphore_mem>>) src(%49 : memref<768xf32, #tpu.memory_space<any>>) dst(%51 : memref<768xf32, #tpu.memory_space<vmem>>)
        }
        %c8_i32_35 = arith.constant 8 : i32
        %40 = arith.index_cast %32 : i32 to index
        %c0_36 = arith.constant 0 : index
        %41 = vector.load %arg2[%40, %c0_36] : memref<8x8xf32, #tpu.memory_space<vmem>>, vector<1x8xf32>
        %c0_37 = arith.constant 0 : index
        %c0_38 = arith.constant 0 : index
        %42 = vector.load %arg11[%c0_37, %c0_38] : memref<8x768xf32, #tpu.memory_space<vmem>>, vector<8x768xf32>
        %cst_39 = arith.constant dense<0.000000e+00> : vector<1x768xf32>
        %43 = tpu.matmul %41, %42, %cst_39 {dimension_numbers = #tpu.dot_dimension_numbers<[1], [0], [0], [1], [0, 0, 1, 1], [], []>} : vector<1x8xf32>, vector<8x768xf32>, vector<1x768xf32> -> vector<1x768xf32>
        %44 = arith.index_cast %32 : i32 to index
        %c0_40 = arith.constant 0 : index
        %45 = vector.load %arg13[%44, %c0_40] : memref<8x768xf32, #tpu.memory_space<vmem>>, vector<1x768xf32>
        tpu.vector_store %arg13[%44, %c0_40], %43 {strides = array<i32>} : memref<8x768xf32, #tpu.memory_space<vmem>>, vector<1x768xf32>,
      } else {
      }
    }
    %c8_i32_0 = arith.constant 8 : i32
    %c0 = arith.constant 0 : index
    %c0_1 = arith.constant 0 : index
    %1 = vector.load %arg2[%c0, %c0_1] : memref<8x8xf32, #tpu.memory_space<vmem>>, vector<8x8xf32>
    %cst = arith.constant dense<0.000000e+00> : vector<8xf32>
    %2 = vector.multi_reduction <add>, %1, %cst [1] : vector<8x8xf32> to vector<8xf32>
    %3 = vector.shape_cast %2 : vector<8xf32> to vector<8x1xf32>
    %cst_2 = arith.constant 1.000000e+00 : f32
    %4 = vector.broadcast %cst_2 : f32 to vector<8x1xf32>
    %5 = arith.maximumf %3, %4 : vector<8x1xf32>
    %c0_3 = arith.constant 0 : index
    %c0_4 = arith.constant 0 : index
    %6 = vector.load %arg13[%c0_3, %c0_4] : memref<8x768xf32, #tpu.memory_space<vmem>>, vector<8x768xf32>
    %7 = vector.broadcast %5 : vector<8x1xf32> to vector<8x768xf32>
    %8 = arith.divf %6, %7 : vector<8x768xf32>
    %9 = arith.truncf %8 : vector<8x768xf32> to vector<8x768xbf16>
    %c0_5 = arith.constant 0 : index
    %c0_6 = arith.constant 0 : index
    %10 = vector.load %arg4[%c0_5, %c0_6] : memref<768x768xbf16, #tpu.memory_space<vmem>>, vector<768x768xbf16>
    %cst_7 = arith.constant dense<0.000000e+00> : vector<8x768xf32>
    %11 = tpu.matmul %9, %10, %cst_7 {dimension_numbers = #tpu.dot_dimension_numbers<[1], [0], [0], [1], [0, 0, 1, 1], [], []>} : vector<8x768xbf16>, vector<768x768xbf16>, vector<8x768xf32> -> vector<8x768xf32>
    %c0_8 = arith.constant 0 : index
    %c0_9 = arith.constant 0 : index
    %12 = vector.load %arg5[%c0_8, %c0_9] : memref<1x768xf32, #tpu.memory_space<vmem>>, vector<1x768xf32>
    %13 = vector.broadcast %12 : vector<1x768xf32> to vector<8x768xf32>
    %14 = arith.addf %11, %13 : vector<8x768xf32>
    %15 = math.tanh %14 : vector<8x768xf32>
    %16 = arith.truncf %15 : vector<8x768xf32> to vector<8x768xbf16>
    %c0_10 = arith.constant 0 : index
    %c0_11 = arith.constant 0 : index
    %17 = vector.load %arg6[%c0_10, %c0_11] : memref<768x256xbf16, #tpu.memory_space<vmem>>, vector<768x256xbf16>
    %cst_12 = arith.constant dense<0.000000e+00> : vector<8x256xf32>
    %18 = tpu.matmul %16, %17, %cst_12 {dimension_numbers = #tpu.dot_dimension_numbers<[1], [0], [0], [1], [0, 0, 1, 1], [], []>} : vector<8x768xbf16>, vector<768x256xbf16>, vector<8x256xf32> -> vector<8x256xf32>
    %c0_13 = arith.constant 0 : index
    %c0_14 = arith.constant 0 : index
    %19 = vector.load %arg7[%c0_13, %c0_14] : memref<1x256xf32, #tpu.memory_space<vmem>>, vector<1x256xf32>
    %20 = vector.broadcast %19 : vector<1x256xf32> to vector<8x256xf32>
    %21 = arith.addf %18, %20 : vector<8x256xf32>
    %cst_15 = arith.constant 0.000000e+00 : f32
    %22 = vector.broadcast %cst_15 : f32 to vector<8x256xf32>
    %23 = arith.maximumf %21, %22 : vector<8x256xf32>
    %24 = arith.truncf %23 : vector<8x256xf32> to vector<8x256xbf16>
    %c0_16 = arith.constant 0 : index
    %c0_17 = arith.constant 0 : index
    %25 = vector.load %arg8[%c0_16, %c0_17] : memref<256x128xbf16, #tpu.memory_space<vmem>>, vector<256x128xbf16>
    %cst_18 = arith.constant dense<0.000000e+00> : vector<8x128xf32>
    %26 = tpu.matmul %24, %25, %cst_18 {dimension_numbers = #tpu.dot_dimension_numbers<[1], [0], [0], [1], [0, 0, 1, 1], [], []>} : vector<8x256xbf16>, vector<256x128xbf16>, vector<8x128xf32> -> vector<8x128xf32>
    %c0_19 = arith.constant 0 : index
    %c0_20 = arith.constant 0 : index
    %27 = vector.load %arg9[%c0_19, %c0_20] : memref<1x128xf32, #tpu.memory_space<vmem>>, vector<1x128xf32>
    %28 = vector.broadcast %27 : vector<1x128xf32> to vector<8x128xf32>
    %29 = arith.addf %26, %28 : vector<8x128xf32>
    %c0_21 = arith.constant 0 : index
    %c0_22 = arith.constant 0 : index
    %30 = vector.load %arg10[%c0_21, %c0_22] : memref<8x128xf32, #tpu.memory_space<vmem>>, vector<8x128xf32>
    tpu.vector_store %arg10[%c0_21, %c0_22], %29 {strides = array<i32>} : memref<8x128xf32, #tpu.memory_space<vmem>>, vector<8x128xf32>,
    return
  }
  func.func @transform_0(%arg0: i32, %arg1: memref<8x8xi32, #tpu.memory_space<smem>>) -> (i32, i32) {
    %c0_i32 = arith.constant 0 : i32
    %c0_i32_0 = arith.constant 0 : i32
    return %arg0, %c0_i32 : i32, i32
  }
  func.func @transform_2(%arg0: i32, %arg1: memref<8x8xi32, #tpu.memory_space<smem>>) -> (i32, i32) {
    %c0_i32 = arith.constant 0 : i32
    %c0_i32_0 = arith.constant 0 : i32
    %c0_i32_1 = arith.constant 0 : i32
    return %c0_i32, %c0_i32_0 : i32, i32
  }
  func.func @transform_3(%arg0: i32, %arg1: memref<8x8xi32, #tpu.memory_space<smem>>) -> (i32, i32) {
    %c0_i32 = arith.constant 0 : i32
    %c0_i32_0 = arith.constant 0 : i32
    %c0_i32_1 = arith.constant 0 : i32
    return %c0_i32, %c0_i32_0 : i32, i32
  }
  func.func @transform_4(%arg0: i32, %arg1: memref<8x8xi32, #tpu.memory_space<smem>>) -> (i32, i32) {
    %c0_i32 = arith.constant 0 : i32
    %c0_i32_0 = arith.constant 0 : i32
    %c0_i32_1 = arith.constant 0 : i32
    return %c0_i32, %c0_i32_0 : i32, i32
  }
  func.func @transform_5(%arg0: i32, %arg1: memref<8x8xi32, #tpu.memory_space<smem>>) -> (i32, i32) {
    %c0_i32 = arith.constant 0 : i32
    %c0_i32_0 = arith.constant 0 : i32
    %c0_i32_1 = arith.constant 0 : i32
    return %c0_i32, %c0_i32_0 : i32, i32
  }
  func.func @transform_6(%arg0: i32, %arg1: memref<8x8xi32, #tpu.memory_space<smem>>) -> (i32, i32) {
    %c0_i32 = arith.constant 0 : i32
    %c0_i32_0 = arith.constant 0 : i32
    %c0_i32_1 = arith.constant 0 : i32
    return %c0_i32, %c0_i32_0 : i32, i32
  }
  func.func @transform_7(%arg0: i32, %arg1: memref<8x8xi32, #tpu.memory_space<smem>>) -> (i32, i32) {
    %c0_i32 = arith.constant 0 : i32
    %c0_i32_0 = arith.constant 0 : i32
    %c0_i32_1 = arith.constant 0 : i32
    return %c0_i32, %c0_i32_0 : i32, i32
  }
  func.func @transform_8(%arg0: i32, %arg1: memref<8x8xi32, #tpu.memory_space<smem>>) -> (i32, i32) {
    %c0_i32 = arith.constant 0 : i32
    %c0_i32_0 = arith.constant 0 : i32
    return %arg0, %c0_i32 : i32, i32
  }
}

</mosaic_0001>

<bundles_post_ra>
// kernel: emotion_forward.1
= control target key start
LH: loop header
LB: loop body
LE: loop exit
PB: predicated region body
PF: predicated region fallthrough
CT: control target
= control target key end

     0   :  { %s5242_s0 = inlined_call_operand.hbm [shape: s32[8,8], index: 0, kind: input, shape index: {}]   ;;  %s5243_s1 = inlined_call_operand.vmem [shape: f32[8,8], index: 1, kind: input, shape index: {}]   ;;  %s5244_s2 = inlined_call_operand.hbm [shape: f32[100,768], index: 2, kind: input, shape index: {}]   ;;  %s5245_s3 = inlined_call_operand.hbm [shape: bf16[768,768], index: 3, kind: input, shape index: {}]   ;;  %s5246_s4 = inlined_call_operand.hbm [shape: f32[1,768], index: 4, kind: input, shape index: {}]   ;;  %s5247_s5 = inlined_call_operand.hbm [shape: bf16[768,256], index: 5, kind: input, shape index: {}]   ;;  %s5248_s6 = inlined_call_operand.hbm [shape: f32[1,256], index: 6, kind: input, shape index: {}]   ;;  %s5249_s7 = inlined_call_operand.hbm [shape: bf16[256,128], index: 7, kind: input, shape index: {}]   ;;  %s5250_s8 = inlined_call_operand.hbm [shape: f32[1,128], index: 8, kind: input, shape index: {}]   ;;  %s5251_s9 = inlined_call_operand.hbm [shape: f32[8,128], index: 9, kind: output, shape index: {}]  }
   0x1   :  { %s4732_s11 = scalar_lea.hbm %s5242_s0, 128 }
   0x2   :  { %p4733_p0 = scmp.ne.s32.totalorder %s5242_s0, %s4732_s11  ;;  %p4736_p1 = scmp.lt.u32.totalorder %s4732_s11, %s5242_s0 }
   0x4   :  { %p4738_p2 = pnand %p4736_p1, %p4733_p0 }
   0x6   :  { %4741 = shalt.err (!%p4738_p2)  }
   0x7   :  { %s4958_s16 = smov [#allocation6]  }
   0x8   :  { %15 = dma.hbm_to_smem %s5242_s0, 128, %s4958_s16, [#allocation5] }
   0x9   :  { %4932 = dma.done.wait [#allocation5], 128 }
   0xa   :  { %4933 = vsyncadd [#allocation5], 4294967168 }
   0xb   :  { %17 = sfence }
   0xc   :  { %18 = vsyncpa [#allocation8], 0 }
   0xd   :  { %19 = vsyncpa [#allocation11], 0 }
   0xe   :  { %20 = vsyncpa [#allocation14], 0 }
   0xf   :  { %21 = vsyncpa [#allocation17], 0 }
  0x10   :  { %22 = vsyncpa [#allocation9], 0  ;;  %s4959_s19 = smov [#allocation10]   ;;  %s4960_s21 = smov [#allocation13]  }
  0x11   :  { %s43_s20 = sshll.u32 %s4959_s19, 4  ;;  %s65_s22 = sshll.u32 %s4960_s21, 4  ;;  %s44_s20 = int_to_ptr.vmem [resolvable:$true] %s43_s20  ;;  %s66_s22 = int_to_ptr.vmem [resolvable:$true] %s65_s22 }
  0x12   :  { %s4742_s25 = scalar_lea.hbm %s5246_s4, 96 }
  0x13   :  { %p4743_p3 = scmp.ne.s32.totalorder %s5246_s4, %s4742_s25  ;;  %p4746_p4 = scmp.lt.u32.totalorder %s4742_s25, %s5246_s4 }
  0x15   :  { %p4748_p5 = pnand %p4746_p4, %p4743_p3 }
  0x17   :  { %4751 = shalt.err (!%p4748_p5)
}
  0x18   :  { %s4752_s29 = scalar_lea.vmem %s44_s20, 96  ;;  %p4757_p7 = scmp.lt.s32.totalorder %s44_s20, %s44_s20 }
  0x19   :  { %p4753_p6 = scmp.ne.s32.totalorder %s44_s20, %s4752_s29  ;;  %p4758_p8 = scmp.lt.s32.totalorder %s4752_s29, %s4752_s29 }
  0x1b   :  { %p4759_p9 = por %p4758_p8, %p4757_p7 }
  0x1d   :  { %p4760_p10 = pnand %p4759_p9, %p4753_p6 }
  0x1f   :  { %4763 = shalt.err (!%p4760_p10)
}
  0x20   :  { %46 = dma.hbm_to_vmem [thread:$0]  %s5246_s4, 96, %s44_s20, [#allocation11]  }
  0x21   :  { %s4764_s13 = scalar_lea.hbm %s5248_s6, 32 }
  0x22   :  { %p4765_p11 = scmp.ne.s32.totalorder %s5248_s6, %s4764_s13  ;;  %p4768_p12 = scmp.lt.u32.totalorder %s4764_s13, %s5248_s6 }
  0x24   :  { %p4770_p13 = pnand %p4768_p12, %p4765_p11 }
  0x26   :  { %4773 = shalt.err (!%p4770_p13)
}
  0x27   :  { %s4774_s18 = scalar_lea.vmem %s66_s22, 32  ;;  %p4779_p1 = scmp.lt.s32.totalorder %s66_s22, %s66_s22 }
  0x28   :  { %p4775_p0 = scmp.ne.s32.totalorder %s66_s22, %s4774_s18  ;;  %p4780_p2 = scmp.lt.s32.totalorder %s4774_s18, %s4774_s18 }
  0x2a   :  { %p4781_p3 = por %p4780_p2, %p4779_p1 }
  0x2c   :  { %p4782_p4 = pnand %p4781_p3, %p4775_p0 }
  0x2e   :  { %4785 = shalt.err (!%p4782_p4)
}
  0x2f   :  { %68 = dma.hbm_to_vmem [thread:$0]  %s5248_s6, 32, %s66_s22, [#allocation14]  }
  0x30   :  { %s4961_s20 = smov [#allocation7]   ;;  %s4786_s25 = scalar_lea.hbm %s5245_s3, 36864 }
  0x31   :  { %s30_s21 = sshll.u32 %s4961_s20, 4  ;;  %p4787_p5 = scmp.ne.s32.totalorder %s5245_s3, %s4786_s25  ;;  %s31_s21 = int_to_ptr.vmem [resolvable:$true] %s30_s21 }
  0x32   :  { %p4790_p6 = scmp.lt.u32.totalorder %s4786_s25, %s5245_s3 }
  0x34   :  { %p4792_p7 = pnand %p4790_p6, %p4787_p5 }
  0x36   :  { %4795 = shalt.err (!%p4792_p7)
}
  0x37   :  { %s4796_s29 = scalar_lea.vmem %s31_s21, 36864  ;;  %p4801_p9 = scmp.lt.s32.totalorder %s31_s21, %s31_s21 }
  0x38   :  { %p4797_p8 = scmp.ne.s32.totalorder %s31_s21, %s4796_s29  ;;  %p4802_p10 = scmp.lt.s32.totalorder %s4796_s29, %s4796_s29 }
  0x3a   :  { %p4803_p11 = por %p4802_p10, %p4801_p9 }
  0x3c   :  { %p4804_p12 = pnand %p4803_p11, %p4797_p8 }
  0x3e   :  { %4807 = shalt.err (!%p4804_p12)
}
  0x3f   :  { %s4962_s6 = smov 384   ;;  %s4963_s22 = smov 24  }
  0x40   :  { %36 = dma.hbm_to_vmem [thread:$0]  %s5245_s3, 36864, %s31_s21, [#allocation8], %s4962_s6, %s4962_s6, %s4963_s22  }
  0x41   :  { %s4964_s11 = smov [#allocation12]   ;;  %s4808_s15 = scalar_lea.hbm %s5247_s5, 12288 }
  0x42   :  { %s52_s12 = sshll.u32 %s4964_s11, 4  ;;  %p4809_p13 = scmp.ne.s32.totalorder %s5247_s5, %s4808_s15  ;;  %s53_s12 = int_to_ptr.vmem [resolvable:$true] %s52_s12 }
  0x43   :  { %p4812_p0 = scmp.lt.u32.totalorder %s4808_s15, %s5247_s5 }
  0x45   :  { %p4814_p1 = pnand %p4812_p0, %p4809_p13 }
  0x47   :  { %4817 = shalt.err (!%p4814_p1)
}
  0x48   :  { %s4818_s19 = scalar_lea.vmem %s53_s12, 12288  ;;  %p4823_p3 = scmp.lt.s32.totalorder %s53_s12, %s53_s12 }
  0x49   :  { %p4819_p2 = scmp.ne.s32.totalorder %s53_s12, %s4818_s19  ;;  %p4824_p4 = scmp.lt.s32.totalorder %s4818_s19, %s4818_s19 }
  0x4b   :  { %p4825_p5 = por %p4824_p4, %p4823_p3 }
  0x4d   :  { %p4826_p6 = pnand %p4825_p5, %p4819_p2 }
  0x4f   :  { %4829 = shalt.err (!%p4826_p6)
}
  0x50   :  { %s4965_s3 = smov 128   ;;  %s4966_s20 = smov 8  }
  0x51   :  { %58 = dma.hbm_to_vmem [thread:$0]  %s5247_s5, 12288, %s53_s12, [#allocation11], %s4965_s3, %s4965_s3, %s4966_s20  }
  0x52   :  { %s4967_s24 = smov [#allocation15]   ;;  %s4830_s27 = scalar_lea.hbm %s5249_s7, 2048 }
  0x53   :  { %s74_s25 = sshll.u32 %s4967_s24, 4  ;;  %p4831_p7 = scmp.ne.s32.totalorder %s5249_s7, %s4830_s27  ;;  %s75_s25 = int_to_ptr.vmem [resolvable:$true] %s74_s25 }
  0x54   :  { %p4834_p8 = scmp.lt.u32.totalorder %s4830_s27, %s5249_s7 }
  0x56   :  { %p4836_p9 = pnand %p4834_p8, %p4831_p7 }
  0x58   :  { %4839 = shalt.err (!%p4836_p9)
}
  0x59   :  { %s4840_s30 = scalar_lea.vmem %s75_s25, 2048  ;;  %p4845_p11 = scmp.lt.s32.totalorder %s75_s25, %s75_s25 }
  0x5a   :  { %p4841_p10 = scmp.ne.s32.totalorder %s75_s25, %s4840_s30  ;;  %p4846_p12 = scmp.lt.s32.totalorder %s4840_s30, %s4840_s30 }
  0x5c   :  { %p4847_p13 = por %p4846_p12, %p4845_p11 }
  0x5e   :  { %p4848_p0 = pnand %p4847_p13, %p4841_p10 }
  0x60   :  { %4851 = shalt.err (!%p4848_p0)
}
  0x61   :  { %s4968_s5 = smov 64   ;;  %s4969_s10 = smov 4  }
  0x62   :  { %80 = dma.hbm_to_vmem [thread:$0]  %s5249_s7, 2048, %s75_s25, [#allocation14], %s4968_s5, %s4968_s5, %s4969_s10  }
  0x63   :  { %s4970_s13 = smov [#allocation16]   ;;  %s4852_s17 = scalar_lea.hbm %s5250_s8, 16 }
  0x64   :  { %s87_s14 = sshll.u32 %s4970_s13, 4  ;;  %p4853_p1 = scmp.ne.s32.totalorder %s5250_s8, %s4852_s17  ;;  %s88_s14 = int_to_ptr.vmem [resolvable:$true] %s87_s14 }
  0x65   :  { %p4856_p2 = scmp.lt.u32.totalorder %s4852_s17, %s5250_s8 }
  0x67   :  { %p4858_p3 = pnand %p4856_p2, %p4853_p1 }
  0x69   :  { %4861 = shalt.err (!%p4858_p3)
}
  0x6a   :  { %s4862_s20 = scalar_lea.vmem %s88_s14, 16  ;;  %s4866_s7 = scalar_lea.vmem %s88_s14, 32 }
  0x6b   :  { %p4863_p4 = scmp.ne.s32.totalorder %s88_s14, %s4862_s20  ;;  %p4867_p5 = scmp.lt.s32.totalorder %s88_s14, %s88_s14 }
  0x6c   :  { %p4868_p6 = scmp.lt.s32.totalorder %s4866_s7, %s4862_s20 }
  0x6e   :  { %p4869_p7 = por %p4868_p6, %p4867_p5 }
  0x70   :  { %p4870_p8 = pnand %p4869_p7, %p4863_p4 }
  0x72   :  { %4873 = shalt.err (!%p4870_p8)
}
  0x73   :  { %90 = dma.hbm_to_vmem [thread:$0]  %s5250_s8, 16, %s88_s14, [#allocation17]  }
  0x74   :  { %4934 = dma.done.wait [#allocation8], 36864  }
  0x75   :  { %4935 = vsyncadd [#allocation8], 4294930432 }
  0x76   :  { %4936 = dma.done.wait [#allocation11], 12384  }
  0x77   :  { %4937 = vsyncadd [#allocation11], 4294954912 }
  0x78   :  { %4938 = dma.done.wait [#allocation14], 2080  }
  0x79   :  { %4939 = vsyncadd [#allocation14], 4294965216 }
  0x7a   :  { %4940 = dma.done.wait [#allocation17], 16  }
  0x7b   :  { %4941 = vsyncadd [#allocation17], 4294967280  ;;  %s5111_s24 = smov 0  }
  0x7c LB: > { %p3606_p9 = scmp.ge.s32.totalorder %s4948_s24, 8  ;;  %s4948_s24 = sphi %s5111_s24, %s115_s24  }
  0x7d   : > { %s5117_s25 = smov (!%p3606_p9), 0  }
  0x7e   : > { %121 = sbr.rel (%p3606_p9) target bundleno = 415 (0x19f), region = 64 }
  0x85 LB: >> { %s128_s8 = sshra.s32 %s4952_s25, 7  ;;  %s133_s26 = sand.u32 127, %s4952_s25  ;;  %s4952_s25 = sphi %s5117_s25, %s127_s25  }
  0x86   : >> { %s130_s0 = sadd.s32 %s4948_s24, %s128_s8  ;;  %s142_s27 = sshrl.u32 %s4952_s25, 3 }
  0x87   : >> { %s3607_s28 = sshll.u32 %s130_s0, 7  ;;  %s143_s29 = sand.u32 7, %s4952_s25  }
  0x88   : >> { %s134_s6 = sadd.s32 %s3607_s28, %s133_s26  ;;  %s144_s22 = smul.u32 48, %s142_s27 }
  0x89   : >> { %s135_s30 = sld [smem:[#allocation6 + %s134_s6]]  ;;  %s147_s19 = scalar_lea.sflag [#allocation3], %s4952_s25 }
  0x8a   : >> { %s145_s5 = sadd.s32 %s144_s22, %s143_s29  ;;  %s4876_s21 = scalar_lea.hbm %s5244_s2, 9984 }
  0x8b   : >> { %s146_s10 = scalar_lea.vmem [#allocation2], %s145_s5 }
  0x8c   : >> { %s149_s11 = sshll.u32 %s146_s10, 4  ;;  %s5127_s11 = int_to_ptr.vmem [resolvable:$true] %s149_s11 }
  0x8f   : >> { %s136_s12 = sshrl.u32 %s135_s30, 3  ;;  %s137_s13 = sand.u32 7, %s135_s30  }
  0x90   : >> { %s138_s14 = smul.u32 48, %s136_s12 }
  0x92   : >> { %s139_s15 = sadd.s32 %s138_s14, %s137_s13 }
  0x93   : >> { %s3608_s16 = sshll.u32 %s139_s15, 4 }
  0x94   : >> { %s5132_s4 = scalar_lea.hbm %s5244_s2, %s3608_s16 }
  0x95   : >> { %s4874_s3 = scalar_lea.hbm %s5132_s4, 96  ;;  %p4877_p11 = scmp.lt.u32.totalorder %s5132_s4, %s5244_s2 }
  0x96   : >> { %p4875_p10 = scmp.ne.s32.totalorder %s5132_s4, %s4874_s3  ;;  %p4878_p12 = scmp.lt.u32.totalorder %s4876_s21, %s4874_s3 }
  0x97   : >> { %p4880_p0 = scmp.lt.u32.totalorder %s4874_s3, %s5132_s4 }
  0x98   : >> { %p4879_p13 = por %p4878_p12, %p4877_p11 }
  0x9a   : >> { %p4881_p1 = por %p4880_p0, %p4879_p13 }
  0x9c   : >> { %p4882_p2 = pnand %p4881_p1, %p4875_p10 }
  0x9e   : >> { %4885 = shalt.err (!%p4882_p2)  }
  0x9f   : >> { %s4886_s26 = scalar_lea.vmem %s5127_s11, 96  ;;  %s4971_s0 = smov [#allocation2]  }
  0xa0   : >> { %p4887_p3 = scmp.ne.s32.totalorder %s5127_s11, %s4886_s26  ;;  %s4888_s27 = sshll.u32 %s4971_s0, 4  ;;  %s4889_s27 = int_to_ptr.vmem [resolvable:$false] %s4888_s27 }
  0xa1   : >> { %s4890_s28 = scalar_lea.vmem %s4889_s27, 768  ;;  %p4891_p4 = scmp.lt.s32.totalorder %s5127_s11, %s4889_s27 }
  0xa2   : >> { %p4892_p5 = scmp.lt.s32.totalorder %s4890_s28, %s4886_s26 }
  0xa4   : >> { %p4893_p6 = por %p4892_p5, %p4891_p4 }
  0xa6   : >> { %p4894_p7 = pnand %p4893_p6, %p4887_p3 }
  0xa8   : >> { %4897 = shalt.err (!%p4894_p7)  }
  0xa9   : >> { %s4972_s29 = smov 128   ;;  %s4973_s6 = smov 1  }
  0xaa   : >> { %152 = dma.hbm_to_vmem [thread:$0]  %s5132_s4, 96, %s5127_s11, %s147_s19, %s4972_s29, %s4972_s29, %s4973_s6 }
  0xab   : >> { %s127_s25 = sadd.s32 1, %s4952_s25  }
  0xac   : >> { %p124_p8 = scmp.ge.s32.totalorder %s127_s25, 8  }
  0xad   : > { %s4954_s22 = smov (%p124_p8), 0  }
  0xae   : > { %126 = sbr.rel (!%p124_p8) target bundleno = 133 (0x85), region = 110 }
  0xb5 LB: >> { %s159_s30 = scalar_lea.sflag [#allocation3], %s4956_s22  ;;  %s4956_s22 = sphi %s4954_s22, %s158_s22  }
  0xb6   : >> { %4942 = dma.done.wait %s159_s30, 96 }
  0xb7   : >> { %4943 = vsyncadd %s159_s30, 4294967200  ;;  %s158_s22 = sadd.s32 1, %s4956_s22  }
  0xb8   : >> { %p155_p9 = scmp.ge.s32.totalorder %s158_s22, 8  }
  0xb9   : > { %v165_v0 = vld [vmem:[#allocation2 + $0x8] sm:$0xff] (%p155_p9)  ;;  %v167_v1 = vld [vmem:[#allocation2 + $0x18] sm:$0xff] (%p155_p9)  ;;  %v164_v2 = vld [vmem:[#allocation2] sm:$0xff] (%p155_p9)  ;;  %s162_s25 = scalar_lea.vmem (%p155_p9), %s5243_s1, %s4948_s24  ;;  %vm170_vm0 = vcmask (%p155_p9), 64512   ;;  %v4974_v5 = vmov (%p155_p9), 0.0   ;;  %v399_v10 = vlaneseq (%p155_p9)  ;;  %s438_s11 = sshra.s32 (%p155_p9), %s4948_s24, 3 }
  0xba   : > { %157 = sbr.rel (!%p155_p9) target bundleno = 181 (0xb5), region = 121  ;;  %174 = vmatprep.subr.mxu0 (%p155_p9), %v165_v0  ;;  %245 = vmatprep.subr.mxu1 (%p155_p9), %v167_v1  ;;  %v166_v3 = vld [vmem:[#allocation2 + $0x10] sm:$0xff] (%p155_p9)  ;;  %v163_v4 = vld [vmem:[%s162_s25] sm:$0x1] (%p155_p9)  ;;  %v169_v6 = vld [vmem:[#allocation2 + $0x28] sm:$0xff] (%p155_p9)  ;;  %s441_s13 = sand.u32 (%p155_p9), 7, %s4948_s24 }
  0xbb   : > { %175 = vmatpush1.msra.mxu0 (%p155_p9), %v164_v2  ;;  %238 = vmatprep.mubr.f32.mxu0 (%p155_p9), %v4974_v5  ;;  %v168_v7 = vld [vmem:[#allocation2 + $0x20] sm:$0xff] (%p155_p9)  ;;  %v4975_v8 = vmov (%p155_p9), 1966171168   ;;  %v400_v12 = vshrl.u32 (%p155_p9), %v399_v10, 7  ;;  %s3612_s12 = smul.u32 (%p155_p9), 48, %s438_s11  ;;  %vm436_vm1 = vcmp.lt.s32.totalorder (%p155_p9), %v399_v10, 768 }
  0xbc   : > { %246 = vmatpush1.msra.mxu1 (%p155_p9), %v166_v3  ;;  %309 = vmatprep.mubr.f32.mxu1 (%p155_p9), %v4974_v5  ;;  %v397_v9 = vunpack.c.l.s4 (%p155_p9), %v4975_v8 }
  0xbd   : > { %3609 = vmatmul.mubr.msk.f32.vlgmr.msra.gmra.mrb[0].mxu0 (%p155_p9), %vm170_vm0, %v163_v4  ;;  %3610 = vmatmul.mubr.msk.f32.vlgmr.msra.gmra.mrb[0].mxu1 (%p155_p9), %vm170_vm0, %v163_v4  ;;  %s444_s14 = sadd.s32 (%p155_p9), %s3612_s12, %s441_s13 }
  0xbe   : > { %316 = vmatprep.subr.mxu0 (%p155_p9), %v169_v6  ;;  %380 = vmatprep.mubr.f32.mxu0 (%p155_p9), %v4974_v5  ;;  %v398_v11 = vunpack.c.0.s8 (%p155_p9), %v397_v9  ;;  %s445_s15 = scalar_lea.vmem (%p155_p9), [#allocation4], %s444_s14 }
  0xbf   : > { %317 = vmatpush1.msra.mxu0 (%p155_p9), %v168_v7 }
  0xc0   : > { %v401_v15 = vsub.s32 (%p155_p9), %v398_v11, %v400_v12 }
  0xc1   : > { %3611 = vmatmul.mubr.msk.f32.vlgmr.msra.gmra.mrb[2].mxu0 %vm170_vm0, %v163_v4 }
 0x190   : > { %v240_v13 = vpop.f32.mrb[0].mxu0  ;;  %v311_v14 = vpop.f32.mrb[0].mxu1 }
 0x191   : > { %v242_v16 = vpop.f32.mrb[1].mxu0  ;;  %v313_v17 = vpop.f32.mrb[1].mxu1 }
 0x192   : > { %v393_v18 = vcombine.low %v240_v13, %v242_v16  ;;  %v394_v19 = vcombine.low %v311_v14, %v313_v17 }
 0x194   : > { %v402_v20 = vrot.slane %v393_v18, %v401_v15  ;;  %v409_v21 = vrot.slane %v394_v19, %v401_v15  ;;  %v382_v22 = vpop.f32.mrb[2].mxu0 }
 0x195   : > { %v384_v23 = vpop.f32.mrb[3].mxu0 }
 0x196   : > { %v417_v24 = vcombine.low %v402_v20, %v409_v21  ;;  %v395_v25 = vcombine.low %v382_v22, %v384_v23 }
 0x198   : > { %v416_v26 = vrot.slane %v395_v25, %v401_v15  ;;  %v424_v27 = vrot.slane %v417_v24, %v401_v15 }
 0x19a   : > { %v431_v28 = vrot.slane %v416_v26, %v401_v15 }
 0x19c   : > { %v432_v29 = vcombine.low %v424_v27, %v431_v28 }
 0x19e   : > { %446 = vst.msk [vmem:[%s445_s15] ss:$8 sm:$0xf] %vm436_vm1, %v432_v29  ;;  %447 = vst.msk [vmem:[%s445_s15] ss:$8 sm:$0x30] %vm436_vm1, %v432_v29 }
 0x19f PF: > { %s115_s24 = sadd.s32 1, %s4948_s24  }
 0x1a0   : > { %p112_p10 = scmp.ge.s32.totalorder %s115_s24, 8  }
 0x1a1   :  { %v448_v30 = vld [vmem:[%s5243_s1] sm:$0xff] (%p112_p10)  ;;  %vm449_vm2 = vcmask (%p112_p10), 64512   ;;  %v4132_v36 = vld [vmem:[#allocation7 + $0x34] ss:$24 sps:$4 sm:$0xff] (%p112_p10)   ;;  %v4136_v38 = vld [vmem:[#allocation7 + $0x30] ss:$24 sps:$4 sm:$0xff] (%p112_p10)  }
 0x1a2   :  { %114 = sbr.rel (!%p112_p10) target bundleno = 124 (0x7c), region = 132  ;;  %v450_v31 = vsel (%p112_p10), %vm449_vm2, %v448_v30, 0.0  ;;  %v4126_v32 = vld [vmem:[#allocation7 + $0x4] ss:$24 sps:$4 sm:$0xff] (%p112_p10)   ;;  %v4130_v34 = vld [vmem:[#allocation7] ss:$24 sps:$4 sm:$0xff] (%p112_p10)  }
 0x1a3   :  { %451 = vadd.xlane.f32.xlu0 (%p112_p10), %v450_v31  ;;  %v4128_v33 = vld [vmem:[#allocation7 + $0xc] ss:$24 sps:$4 sm:$0xff] (%p112_p10)   ;;  %v4131_v35 = vld [vmem:[#allocation7 + $0x8] ss:$24 sps:$4 sm:$0xff] (%p112_p10)   ;;  %2233 = vmatprep.subr.bf16.mxu0 (%p112_p10), %v4126_v32  ;;  %v4134_v37 = vld [vmem:[#allocation7 + $0x3c] ss:$24 sps:$4 sm:$0xff] (%p112_p10)  }
 0x1a4   :  { %2356 = vmatprep.subr.bf16.mxu1 (%p112_p10), %v4128_v33  ;;  %2234 = vmatpush1.bf16.msra.mxu0 (%p112_p10), %v4130_v34  ;;  %v4137_v39 = vld [vmem:[#allocation7 + $0x38] ss:$24 sps:$4 sm:$0xff] (%p112_p10)   ;;  %v4138_v40 = vld [vmem:[#allocation7 + $0x64] ss:$24 sps:$4 sm:$0xff] (%p112_p10)   ;;  %v4143_v43 = vld [vmem:[#allocation7 + $0x68] ss:$24 sps:$4 sm:$0xff] (%p112_p10)  }
 0x1a5   :  { %2357 = vmatpush1.bf16.msra.mxu1 (%p112_p10), %v4131_v35  ;;  %2235 = vmatprep.subr.bf16.mxu0 (%p112_p10), %v4132_v36  ;;  %v4140_v41 = vld [vmem:[#allocation7 + $0x6c] ss:$24 sps:$4 sm:$0xff] (%p112_p10)   ;;  %v4142_v42 = vld [vmem:[#allocation7 + $0x60] ss:$24 sps:$4 sm:$0xff] (%p112_p10)   ;;  %v4146_v45 = vld [vmem:[#allocation7 + $0x9c] ss:$24 sps:$4 sm:$0xff] (%p112_p10)  }
 0x1a6   :  { %2358 = vmatprep.subr.bf16.mxu1 (%p112_p10), %v4134_v37  ;;  %v4144_v44 = vld [vmem:[#allocation7 + $0x94] ss:$24 sps:$4 sm:$0xff] (%p112_p10)   ;;  %v4148_v46 = vld [vmem:[#allocation7 + $0x90] ss:$24 sps:$4 sm:$0xff] (%p112_p10)   ;;  %v4150_v48 = vld [vmem:[#allocation7 + $0xc4] ss:$24 sps:$4 sm:$0xff] (%p112_p10)  }
 0x1a7   :  { %v4149_v47 = vld [vmem:[#allocation7 + $0x98] ss:$24 sps:$4 sm:$0xff] (%p112_p10)   ;;  %v4152_v49 = vld [vmem:[#allocation7 + $0xcc] ss:$24 sps:$4 sm:$0xff] (%p112_p10)   ;;  %v4155_v51 = vld [vmem:[#allocation7 + $0xc8] ss:$24 sps:$4 sm:$0xff] (%p112_p10)  }
 0x1a8   :  { %2236 = vmatpush1.bf16.msra.mxu0 (%p112_p10), %v4136_v38  ;;  %v4154_v50 = vld [vmem:[#allocation7 + $0xc0] ss:$24 sps:$4 sm:$0xff] (%p112_p10)   ;;  %v4156_v52 = vld [vmem:[#allocation7 + $0xf4] ss:$24 sps:$4 sm:$0xff] (%p112_p10)   ;;  %v4160_v54 = vld [vmem:[#allocation7 + $0xf0] ss:$24 sps:$4 sm:$0xff] (%p112_p10)  }
 0x1a9   :  { %2359 = vmatpush1.bf16.msra.mxu1 %v4137_v39  ;;  %2237 = vmatprep.subr.bf16.mxu0 %v4138_v40  ;;  %v4158_v53 = vld [vmem:[#allocation7 + $0xfc] ss:$24 sps:$4 sm:$0xff]   ;;  %v4161_v55 = vld [vmem:[#allocation7 + $0xf8] ss:$24 sps:$4 sm:$0xff]   ;;  %v4164_v57 = vld [vmem:[#allocation7 + $0x12c] ss:$24 sps:$4 sm:$0xff]  }
 0x1aa   :  { %2360 = vmatprep.subr.bf16.mxu1 %v4140_v41  ;;  %v4162_v56 = vld [vmem:[#allocation7 + $0x124] ss:$24 sps:$4 sm:$0xff]   ;;  %v4166_v58 = vld [vmem:[#allocation7 + $0x120] ss:$24 sps:$4 sm:$0xff]   ;;  %v4168_v60 = vld [vmem:[#allocation7 + $0x154] ss:$24 sps:$4 sm:$0xff]  }
 0x1ab   :  { %v4167_v59 = vld [vmem:[#allocation7 + $0x128] ss:$24 sps:$4 sm:$0xff]   ;;  %v4170_v61 = vld [vmem:[#allocation7 + $0x15c] ss:$24 sps:$4 sm:$0xff]   ;;  %v4173_v63 = vld [vmem:[#allocation7 + $0x158] ss:$24 sps:$4 sm:$0xff]  }
 0x1ac   :  { %2238 = vmatpush1.bf16.msra.mxu0 %v4142_v42  ;;  %v4172_v62 = vld [vmem:[#allocation7 + $0x150] ss:$24 sps:$4 sm:$0xff]   ;;  %v4174_v0 = vld [vmem:[#allocation7 + $0x184] ss:$24 sps:$4 sm:$0xff]   ;;  %v4178_v2 = vld [vmem:[#allocation7 + $0x180] ss:$24 sps:$4 sm:$0xff]  }
 0x1ad   :  { %2361 = vmatpush1.bf16.msra.mxu1 %v4143_v43  ;;  %2239 = vmatprep.subr.bf16.mxu0 %v4144_v44  ;;  %v4176_v1 = vld [vmem:[#allocation7 + $0x18c] ss:$24 sps:$4 sm:$0xff]   ;;  %v4179_v3 = vld [vmem:[#allocation7 + $0x188] ss:$24 sps:$4 sm:$0xff]   ;;  %v4182_v5 = vld [vmem:[#allocation7 + $0x1bc] ss:$24 sps:$4 sm:$0xff]  }
 0x1ae   :  { %2362 = vmatprep.subr.bf16.mxu1 %v4146_v45  ;;  %v4180_v4 = vld [vmem:[#allocation7 + $0x1b4] ss:$24 sps:$4 sm:$0xff]   ;;  %v4184_v6 = vld [vmem:[#allocation7 + $0x1b0] ss:$24 sps:$4 sm:$0xff]   ;;  %v4186_v8 = vld [vmem:[#allocation7 + $0x1e4] ss:$24 sps:$4 sm:$0xff]  }
 0x1af   :  { %v4185_v7 = vld [vmem:[#allocation7 + $0x1b8] ss:$24 sps:$4 sm:$0xff]   ;;  %v4188_v9 = vld [vmem:[#allocation7 + $0x1ec] ss:$24 sps:$4 sm:$0xff]   ;;  %v4191_v11 = vld [vmem:[#allocation7 + $0x1e8] ss:$24 sps:$4 sm:$0xff]  }
 0x1b0   :  { %2240 = vmatpush1.bf16.msra.mxu0 %v4148_v46  ;;  %v4190_v10 = vld [vmem:[#allocation7 + $0x1e0] ss:$24 sps:$4 sm:$0xff]   ;;  %v4192_v12 = vld [vmem:[#allocation7 + $0x214] ss:$24 sps:$4 sm:$0xff]   ;;  %v4196_v14 = vld [vmem:[#allocation7 + $0x210] ss:$24 sps:$4 sm:$0xff]  }
 0x1b1   :  { %2363 = vmatpush1.bf16.msra.mxu1 %v4149_v47  ;;  %2241 = vmatprep.subr.bf16.mxu0 %v4150_v48  ;;  %v4194_v13 = vld [vmem:[#allocation7 + $0x21c] ss:$24 sps:$4 sm:$0xff]   ;;  %v4197_v15 = vld [vmem:[#allocation7 + $0x218] ss:$24 sps:$4 sm:$0xff]   ;;  %v4200_v17 = vld [vmem:[#allocation7 + $0x24c] ss:$24 sps:$4 sm:$0xff]  }
 0x1b2   :  { %2364 = vmatprep.subr.bf16.mxu1 %v4152_v49  ;;  %v4198_v16 = vld [vmem:[#allocation7 + $0x244] ss:$24 sps:$4 sm:$0xff]   ;;  %v4202_v18 = vld [vmem:[#allocation7 + $0x240] ss:$24 sps:$4 sm:$0xff]   ;;  %v4204_v20 = vld [vmem:[#allocation7 + $0x274] ss:$24 sps:$4 sm:$0xff]  }
 0x1b3   :  { %v4203_v19 = vld [vmem:[#allocation7 + $0x248] ss:$24 sps:$4 sm:$0xff]   ;;  %v4206_v21 = vld [vmem:[#allocation7 + $0x27c] ss:$24 sps:$4 sm:$0xff]   ;;  %v4209_v23 = vld [vmem:[#allocation7 + $0x278] ss:$24 sps:$4 sm:$0xff]  }
 0x1b4   :  { %2242 = vmatpush1.bf16.msra.mxu0 %v4154_v50  ;;  %v4208_v22 = vld [vmem:[#allocation7 + $0x270] ss:$24 sps:$4 sm:$0xff]   ;;  %v4210_v24 = vld [vmem:[#allocation7 + $0x2a4] ss:$24 sps:$4 sm:$0xff]   ;;  %v4214_v26 = vld [vmem:[#allocation7 + $0x2a0] ss:$24 sps:$4 sm:$0xff]  }
 0x1b5   :  { %2365 = vmatpush1.bf16.msra.mxu1 %v4155_v51  ;;  %2243 = vmatprep.subr.bf16.mxu0 %v4156_v52  ;;  %v4212_v25 = vld [vmem:[#allocation7 + $0x2ac] ss:$24 sps:$4 sm:$0xff]   ;;  %v4215_v27 = vld [vmem:[#allocation7 + $0x2a8] ss:$24 sps:$4 sm:$0xff]   ;;  %v4218_v29 = vld [vmem:[#allocation7 + $0x2dc] ss:$24 sps:$4 sm:$0xff]  }
 0x1b6   :  { %2366 = vmatprep.subr.bf16.mxu1 %v4158_v53  ;;  %v4216_v28 = vld [vmem:[#allocation7 + $0x2d4] ss:$24 sps:$4 sm:$0xff]   ;;  %v4220_v30 = vld [vmem:[#allocation7 + $0x2d0] ss:$24 sps:$4 sm:$0xff]   ;;  %v4224_v32 = vld [vmem:[#allocation7 + $0x304] ss:$24 sps:$4 sm:$0xff]  }
 0x1b7   :  { %v4221_v31 = vld [vmem:[#allocation7 + $0x2d8] ss:$24 sps:$4 sm:$0xff]   ;;  %v4227_v33 = vld [vmem:[#allocation7 + $0x30c] ss:$24 sps:$4 sm:$0xff]   ;;  %v4225_v42 = vld [vmem:[#allocation7 + $0x308] ss:$24 sps:$4 sm:$0xff]  }
 0x1b8   :  { %2244 = vmatpush1.bf16.msra.mxu0 %v4160_v54  ;;  %v455_v36 = vld [vmem:[#allocation4 + $0x8] sm:$0xff]  ;;  %v454_v37 = vld [vmem:[#allocation4] sm:$0xff]  ;;  %v457_v38 = vld [vmem:[#allocation4 + $0x18] sm:$0xff]  ;;  %s4976_s1 = smov [#allocation18]  }
 0x1b9   :  { %2367 = vmatpush1.bf16.msra.mxu1 %v4161_v55  ;;  %2245 = vmatprep.subr.bf16.mxu0 %v4162_v56  ;;  %v4222_v41 = vld [vmem:[#allocation7 + $0x300] ss:$24 sps:$4 sm:$0xff]   ;;  %v4230_v47 = vld [vmem:[#allocation7 + $0x334] ss:$24 sps:$4 sm:$0xff]   ;;  %v4228_v48 = vld [vmem:[#allocation7 + $0x330] ss:$24 sps:$4 sm:$0xff]  }
 0x1ba   :  { %2368 = vmatprep.subr.bf16.mxu1 %v4164_v57  ;;  %v4233_v49 = vld [vmem:[#allocation7 + $0x33c] ss:$24 sps:$4 sm:$0xff]   ;;  %v4231_v51 = vld [vmem:[#allocation7 + $0x338] ss:$24 sps:$4 sm:$0xff]   ;;  %v4239_v53 = vld [vmem:[#allocation7 + $0x36c] ss:$24 sps:$4 sm:$0xff]  }
 0x1bb   :  { %v4236_v52 = vld [vmem:[#allocation7 + $0x364] ss:$24 sps:$4 sm:$0xff]   ;;  %v4234_v54 = vld [vmem:[#allocation7 + $0x360] ss:$24 sps:$4 sm:$0xff]   ;;  %v4242_v56 = vld [vmem:[#allocation7 + $0x394] ss:$24 sps:$4 sm:$0xff]  }
 0x1bc   :  { %2246 = vmatpush1.bf16.msra.mxu0 %v4166_v58  ;;  %v4237_v55 = vld [vmem:[#allocation7 + $0x368] ss:$24 sps:$4 sm:$0xff]   ;;  %v4245_v57 = vld [vmem:[#allocation7 + $0x39c] ss:$24 sps:$4 sm:$0xff]   ;;  %s3511_s2 = sshll.u32 %s4976_s1, 4  ;;  %s3512_s2 = int_to_ptr.vmem [resolvable:$true] %s3511_s2 }
 0x1bd   :  { %2369 = vmatpush1.bf16.msra.mxu1 %v4167_v59  ;;  %2247 = vmatprep.subr.bf16.mxu0 %v4168_v60  ;;  %v4240_v58 = vld [vmem:[#allocation7 + $0x390] ss:$24 sps:$4 sm:$0xff]   ;;  %v4248_v60 = vld [vmem:[#allocation7 + $0x3c4] ss:$24 sps:$4 sm:$0xff]   ;;  %s4898_s24 = scalar_lea.vmem %s3512_s2, 128  ;;  %p4903_p12 = scmp.lt.s32.totalorder %s3512_s2, %s3512_s2 }
 0x1be   :  { %2370 = vmatprep.subr.bf16.mxu1 %v4170_v61  ;;  %v4243_v59 = vld [vmem:[#allocation7 + $0x398] ss:$24 sps:$4 sm:$0xff]   ;;  %v4251_v61 = vld [vmem:[#allocation7 + $0x3cc] ss:$24 sps:$4 sm:$0xff]   ;;  %p4899_p11 = scmp.ne.s32.totalorder %s3512_s2, %s4898_s24  ;;  %p4904_p13 = scmp.lt.s32.totalorder %s4898_s24, %s4898_s24 }
 0x1c0   :  { %2248 = vmatpush1.bf16.msra.mxu0 %v4172_v62  ;;  %v4246_v62 = vld [vmem:[#allocation7 + $0x3c0] ss:$24 sps:$4 sm:$0xff]   ;;  %p4905_p0 = por %p4904_p13, %p4903_p12 }
 0x1c1   :  { %2371 = vmatpush1.bf16.msra.mxu1 %v4173_v63  ;;  %2249 = vmatprep.subr.bf16.mxu0 %v4174_v0  ;;  %v4249_v63 = vld [vmem:[#allocation7 + $0x3c8] ss:$24 sps:$4 sm:$0xff]   ;;  %v4254_v0 = vld [vmem:[#allocation7 + $0x3f4] ss:$24 sps:$4 sm:$0xff]  }
 0x1c2   :  { %2372 = vmatprep.subr.bf16.mxu1 %v4176_v1  ;;  %v4257_v1 = vld [vmem:[#allocation7 + $0x3fc] ss:$24 sps:$4 sm:$0xff]   ;;  %p4906_p1 = pnand %p4905_p0, %p4899_p11 }
 0x1c4   :  { %2250 = vmatpush1.bf16.msra.mxu0 %v4178_v2  ;;  %v4252_v2 = vld [vmem:[#allocation7 + $0x3f0] ss:$24 sps:$4 sm:$0xff]  }
 0x1c5   :  { %2373 = vmatpush1.bf16.msra.mxu1 %v4179_v3  ;;  %2251 = vmatprep.subr.bf16.mxu0 %v4180_v4  ;;  %v4255_v3 = vld [vmem:[#allocation7 + $0x3f8] ss:$24 sps:$4 sm:$0xff]   ;;  %v4260_v4 = vld [vmem:[#allocation7 + $0x424] ss:$24 sps:$4 sm:$0xff]  }
 0x1c6   :  { %2374 = vmatprep.subr.bf16.mxu1 %v4182_v5  ;;  %v4263_v5 = vld [vmem:[#allocation7 + $0x42c] ss:$24 sps:$4 sm:$0xff]  }
 0x1c8   :  { %2252 = vmatpush1.bf16.msra.mxu0 %v4184_v6  ;;  %v4258_v6 = vld [vmem:[#allocation7 + $0x420] ss:$24 sps:$4 sm:$0xff]  }
 0x1c9   :  { %2375 = vmatpush1.bf16.msra.mxu1 %v4185_v7  ;;  %2253 = vmatprep.subr.bf16.mxu0 %v4186_v8  ;;  %v4261_v7 = vld [vmem:[#allocation7 + $0x428] ss:$24 sps:$4 sm:$0xff]   ;;  %v4266_v8 = vld [vmem:[#allocation7 + $0x454] ss:$24 sps:$4 sm:$0xff]  }
 0x1ca   :  { %2376 = vmatprep.subr.bf16.mxu1 %v4188_v9  ;;  %v4269_v9 = vld [vmem:[#allocation7 + $0x45c] ss:$24 sps:$4 sm:$0xff]  }
 0x1cc   :  { %2254 = vmatpush1.bf16.msra.mxu0 %v4190_v10  ;;  %v4264_v10 = vld [vmem:[#allocation7 + $0x450] ss:$24 sps:$4 sm:$0xff]  }
 0x1cd   :  { %2377 = vmatpush1.bf16.msra.mxu1 %v4191_v11  ;;  %2255 = vmatprep.subr.bf16.mxu0 %v4192_v12  ;;  %v4267_v11 = vld [vmem:[#allocation7 + $0x458] ss:$24 sps:$4 sm:$0xff]   ;;  %v4272_v12 = vld [vmem:[#allocation7 + $0x484] ss:$24 sps:$4 sm:$0xff]  }
 0x1ce   :  { %2378 = vmatprep.subr.bf16.mxu1 %v4194_v13  ;;  %v4275_v13 = vld [vmem:[#allocation7 + $0x48c] ss:$24 sps:$4 sm:$0xff]  }
 0x1d0   :  { %2256 = vmatpush1.bf16.msra.mxu0 %v4196_v14  ;;  %v4270_v14 = vld [vmem:[#allocation7 + $0x480] ss:$24 sps:$4 sm:$0xff]  }
 0x1d1   :  { %2379 = vmatpush1.bf16.msra.mxu1 %v4197_v15  ;;  %2257 = vmatprep.subr.bf16.mxu0 %v4198_v16  ;;  %v4273_v15 = vld [vmem:[#allocation7 + $0x488] ss:$24 sps:$4 sm:$0xff]   ;;  %v4278_v16 = vld [vmem:[#allocation7 + $0x4b4] ss:$24 sps:$4 sm:$0xff]  }
 0x1d2   :  { %2380 = vmatprep.subr.bf16.mxu1 %v4200_v17  ;;  %v4281_v17 = vld [vmem:[#allocation7 + $0x4bc] ss:$24 sps:$4 sm:$0xff]  }
 0x1d4   :  { %2258 = vmatpush1.bf16.msra.mxu0 %v4202_v18  ;;  %v4276_v18 = vld [vmem:[#allocation7 + $0x4b0] ss:$24 sps:$4 sm:$0xff]  }
 0x1d5   :  { %2381 = vmatpush1.bf16.msra.mxu1 %v4203_v19  ;;  %2259 = vmatprep.subr.bf16.mxu0 %v4204_v20  ;;  %v4279_v19 = vld [vmem:[#allocation7 + $0x4b8] ss:$24 sps:$4 sm:$0xff]   ;;  %v4284_v20 = vld [vmem:[#allocation7 + $0x4e4] ss:$24 sps:$4 sm:$0xff]  }
 0x1d6   :  { %2382 = vmatprep.subr.bf16.mxu1 %v4206_v21  ;;  %v4287_v21 = vld [vmem:[#allocation7 + $0x4ec] ss:$24 sps:$4 sm:$0xff]  }
 0x1d8   :  { %2260 = vmatpush1.bf16.msra.mxu0 %v4208_v22  ;;  %v4282_v22 = vld [vmem:[#allocation7 + $0x4e0] ss:$24 sps:$4 sm:$0xff]  }
 0x1d9   :  { %2383 = vmatpush1.bf16.msra.mxu1 %v4209_v23  ;;  %2261 = vmatprep.subr.bf16.mxu0 %v4210_v24  ;;  %v4285_v23 = vld [vmem:[#allocation7 + $0x4e8] ss:$24 sps:$4 sm:$0xff]   ;;  %v4290_v24 = vld [vmem:[#allocation7 + $0x514] ss:$24 sps:$4 sm:$0xff]  }
 0x1da   :  { %2384 = vmatprep.subr.bf16.mxu1 %v4212_v25  ;;  %v4293_v25 = vld [vmem:[#allocation7 + $0x51c] ss:$24 sps:$4 sm:$0xff]  }
 0x1dc   :  { %2262 = vmatpush1.bf16.msra.mxu0 %v4214_v26  ;;  %v4288_v26 = vld [vmem:[#allocation7 + $0x510] ss:$24 sps:$4 sm:$0xff]  }
 0x1dd   :  { %2385 = vmatpush1.bf16.msra.mxu1 %v4215_v27  ;;  %2263 = vmatprep.subr.bf16.mxu0 %v4216_v28  ;;  %v4291_v27 = vld [vmem:[#allocation7 + $0x518] ss:$24 sps:$4 sm:$0xff]   ;;  %v4296_v28 = vld [vmem:[#allocation7 + $0x544] ss:$24 sps:$4 sm:$0xff]  }
 0x1de   :  { %2386 = vmatprep.subr.bf16.mxu1 %v4218_v29  ;;  %v4299_v29 = vld [vmem:[#allocation7 + $0x54c] ss:$24 sps:$4 sm:$0xff]  }
 0x1e0   :  { %2264 = vmatpush1.bf16.msra.mxu0 %v4220_v30  ;;  %v4294_v30 = vld [vmem:[#allocation7 + $0x540] ss:$24 sps:$4 sm:$0xff]  }
 0x1e1   :  { %2387 = vmatpush1.bf16.msra.mxu1 %v4221_v31  ;;  %2274 = vmatprep.subr.bf16.mxu0 %v4224_v32  ;;  %v4297_v31 = vld [vmem:[#allocation7 + $0x548] ss:$24 sps:$4 sm:$0xff]   ;;  %v4302_v32 = vld [vmem:[#allocation7 + $0x574] ss:$24 sps:$4 sm:$0xff]  }
 0x1e2   :  { %2397 = vmatprep.subr.bf16.mxu1 %v4227_v33  ;;  %v4305_v33 = vld [vmem:[#allocation7 + $0x57c] ss:$24 sps:$4 sm:$0xff]  }
 0x230   :  { %v452_v34 = vpop.xlane.xlu0 %451 }
 0x231   :  { %v453_v35 = vmax.f32 %v452_v34, 1.0  ;;  %v4300_v34 = vld [vmem:[#allocation7 + $0x570] ss:$24 sps:$4 sm:$0xff]  }
 0x233   :  { %4718 = vrcp.f32 %v453_v35  ;;  %v4303_v35 = vld [vmem:[#allocation7 + $0x578] ss:$24 sps:$4 sm:$0xff]  }
 0x23d   :  { %v5165_v39 = vpop.eup %4718 }
 0x23e   :  { %v462_v40 = vmul.f32 %v5165_v39, %v455_v36  ;;  %v461_v43 = vmul.f32 %v5165_v39, %v454_v37  ;;  %v464_v44 = vmul.f32 %v5165_v39, %v457_v38  ;;  %v4308_v36 = vld [vmem:[#allocation7 + $0x5a4] ss:$24 sps:$4 sm:$0xff]   ;;  %v4306_v38 = vld [vmem:[#allocation7 + $0x5a0] ss:$24 sps:$4 sm:$0xff]  }
 0x23f   :  { %v4311_v37 = vld [vmem:[#allocation7 + $0x5ac] ss:$24 sps:$4 sm:$0xff]  }
 0x240   :  { %v5170_v45 = vpack.c.bf16 %v462_v40, %v462_v40  ;;  %v5172_v46 = vpack.c.bf16 %v461_v43, %v461_v43  ;;  %v5178_v50 = vpack.c.bf16 %v464_v44, %v464_v44  ;;  %v4309_v40 = vld [vmem:[#allocation7 + $0x5a8] ss:$24 sps:$4 sm:$0xff]   ;;  %v459_v44 = vld [vmem:[#allocation4 + $0x28] sm:$0xff] }
 0x241   :  { %v456_v43 = vld [vmem:[#allocation4 + $0x10] sm:$0xff] }
 0x242   :  { %2265 = vmatprep.mubr.bf16.mxu0 %v5170_v45  ;;  %2388 = vmatprep.mubr.bf16.mxu1 %v5170_v45 }
 0x243   :  { %2266 = vmatmul.mubr.bf16.vlgmr.msra.gmra.mrb[0].mxu0 %v5172_v46  ;;  %2389 = vmatmul.mubr.bf16.vlgmr.msra.gmra.mrb[0].mxu1 %v5172_v46 }
 0x244   :  { %2275 = vmatpush1.bf16.msra.mxu0 %v4222_v41  ;;  %2398 = vmatpush1.bf16.msra.mxu1 %v4225_v42  ;;  %v4314_v41 = vld [vmem:[#allocation7 + $0x5d4] ss:$24 sps:$4 sm:$0xff]  }
 0x245   :  { %2306 = vmatprep.mubr.bf16.mxu0 %v5178_v50  ;;  %2429 = vmatprep.mubr.bf16.mxu1 %v5178_v50  ;;  %v4317_v42 = vld [vmem:[#allocation7 + $0x5dc] ss:$24 sps:$4 sm:$0xff]  }
 0x246   :  { %2276 = vmatprep.subr.bf16.mxu0 %v4230_v47  ;;  %2399 = vmatprep.subr.bf16.mxu1 %v4233_v49  ;;  %v4312_v47 = vld [vmem:[#allocation7 + $0x5d0] ss:$24 sps:$4 sm:$0xff]   ;;  %v463_v49 = vmul.f32 %v5165_v39, %v456_v43  ;;  %v4398_v43 = vld [vmem:[#allocation7 + $0x874] ss:$24 sps:$4 sm:$0xff]  }
 0x248   :  { %2277 = vmatpush1.bf16.msra.mxu0 %v4228_v48  ;;  %2400 = vmatpush1.bf16.msra.mxu1 %v4231_v51  ;;  %v4315_v48 = vld [vmem:[#allocation7 + $0x5d8] ss:$24 sps:$4 sm:$0xff]   ;;  %v4320_v51 = vld [vmem:[#allocation7 + $0x604] ss:$24 sps:$4 sm:$0xff]  }
 0x249   :  { %2278 = vmatprep.subr.bf16.mxu0 %v4236_v52  ;;  %2401 = vmatprep.subr.bf16.mxu1 %v4239_v53  ;;  %v4323_v52 = vld [vmem:[#allocation7 + $0x60c] ss:$24 sps:$4 sm:$0xff]   ;;  %v466_v53 = vmul.f32 %v5165_v39, %v459_v44  ;;  %v4401_v44 = vld [vmem:[#allocation7 + $0x87c] ss:$24 sps:$4 sm:$0xff]  }
 0x24c   :  { %2279 = vmatpush1.bf16.msra.mxu0 %v4234_v54  ;;  %2402 = vmatpush1.bf16.msra.mxu1 %v4237_v55  ;;  %v4318_v54 = vld [vmem:[#allocation7 + $0x600] ss:$24 sps:$4 sm:$0xff]   ;;  %v5184_v55 = vpack.c.bf16 %v463_v49, %v463_v49  ;;  %v4404_v49 = vld [vmem:[#allocation7 + $0x8a4] ss:$24 sps:$4 sm:$0xff]  }
 0x24d   :  { %2280 = vmatprep.subr.bf16.mxu0 %v4242_v56  ;;  %2403 = vmatprep.subr.bf16.mxu1 %v4245_v57  ;;  %v4321_v56 = vld [vmem:[#allocation7 + $0x608] ss:$24 sps:$4 sm:$0xff]   ;;  %v5186_v57 = vpack.c.bf16 %v466_v53, %v466_v53 }
 0x24e   :  { %v4405_v53 = vld [vmem:[#allocation7 + $0x8a8] ss:$24 sps:$4 sm:$0xff]  }
 0x250   :  { %2281 = vmatpush1.bf16.msra.mxu0 %v4240_v58  ;;  %2404 = vmatpush1.bf16.msra.mxu1 %v4243_v59  ;;  %v4326_v58 = vld [vmem:[#allocation7 + $0x634] ss:$24 sps:$4 sm:$0xff]  }
 0x251   :  { %2282 = vmatprep.subr.bf16.mxu0 %v4248_v60  ;;  %2405 = vmatprep.subr.bf16.mxu1 %v4251_v61  ;;  %v4329_v59 = vld [vmem:[#allocation7 + $0x63c] ss:$24 sps:$4 sm:$0xff]   ;;  %v4324_v60 = vld [vmem:[#allocation7 + $0x630] ss:$24 sps:$4 sm:$0xff]  }
 0x252   :  { %v4327_v61 = vld [vmem:[#allocation7 + $0x638] ss:$24 sps:$4 sm:$0xff]  }
 0x254   :  { %2283 = vmatpush1.bf16.msra.mxu0 %v4246_v62  ;;  %2406 = vmatpush1.bf16.msra.mxu1 %v4249_v63  ;;  %v4332_v62 = vld [vmem:[#allocation7 + $0x664] ss:$24 sps:$4 sm:$0xff]  }
 0x255   :  { %2284 = vmatprep.subr.bf16.mxu0 %v4254_v0  ;;  %2407 = vmatprep.subr.bf16.mxu1 %v4257_v1  ;;  %v4335_v63 = vld [vmem:[#allocation7 + $0x66c] ss:$24 sps:$4 sm:$0xff]   ;;  %v4330_v0 = vld [vmem:[#allocation7 + $0x660] ss:$24 sps:$4 sm:$0xff]  }
 0x256   :  { %v4333_v1 = vld [vmem:[#allocation7 + $0x668] ss:$24 sps:$4 sm:$0xff]  }
 0x258   :  { %2285 = vmatpush1.bf16.msra.mxu0 %v4252_v2  ;;  %2408 = vmatpush1.bf16.msra.mxu1 %v4255_v3  ;;  %v4338_v2 = vld [vmem:[#allocation7 + $0x694] ss:$24 sps:$4 sm:$0xff]  }
 0x259   :  { %2286 = vmatprep.subr.bf16.mxu0 %v4260_v4  ;;  %2409 = vmatprep.subr.bf16.mxu1 %v4263_v5  ;;  %v4341_v3 = vld [vmem:[#allocation7 + $0x69c] ss:$24 sps:$4 sm:$0xff]   ;;  %v4336_v4 = vld [vmem:[#allocation7 + $0x690] ss:$24 sps:$4 sm:$0xff]  }
 0x25a   :  { %v4339_v5 = vld [vmem:[#allocation7 + $0x698] ss:$24 sps:$4 sm:$0xff]  }
 0x25c   :  { %2287 = vmatpush1.bf16.msra.mxu0 %v4258_v6  ;;  %2410 = vmatpush1.bf16.msra.mxu1 %v4261_v7  ;;  %v4344_v6 = vld [vmem:[#allocation7 + $0x6c4] ss:$24 sps:$4 sm:$0xff]  }
 0x25d   :  { %2288 = vmatprep.subr.bf16.mxu0 %v4266_v8  ;;  %2411 = vmatprep.subr.bf16.mxu1 %v4269_v9  ;;  %v4347_v7 = vld [vmem:[#allocation7 + $0x6cc] ss:$24 sps:$4 sm:$0xff]   ;;  %v4342_v8 = vld [vmem:[#allocation7 + $0x6c0] ss:$24 sps:$4 sm:$0xff]  }
 0x25e   :  { %v4345_v9 = vld [vmem:[#allocation7 + $0x6c8] ss:$24 sps:$4 sm:$0xff]  }
 0x260   :  { %2289 = vmatpush1.bf16.msra.mxu0 %v4264_v10  ;;  %2412 = vmatpush1.bf16.msra.mxu1 %v4267_v11  ;;  %v4350_v10 = vld [vmem:[#allocation7 + $0x6f4] ss:$24 sps:$4 sm:$0xff]  }
 0x261   :  { %2290 = vmatprep.subr.bf16.mxu0 %v4272_v12  ;;  %2413 = vmatprep.subr.bf16.mxu1 %v4275_v13  ;;  %v4353_v11 = vld [vmem:[#allocation7 + $0x6fc] ss:$24 sps:$4 sm:$0xff]   ;;  %v4348_v12 = vld [vmem:[#allocation7 + $0x6f0] ss:$24 sps:$4 sm:$0xff]  }
 0x262   :  { %v4351_v13 = vld [vmem:[#allocation7 + $0x6f8] ss:$24 sps:$4 sm:$0xff]  }
 0x264   :  { %2291 = vmatpush1.bf16.msra.mxu0 %v4270_v14  ;;  %2414 = vmatpush1.bf16.msra.mxu1 %v4273_v15  ;;  %v4356_v14 = vld [vmem:[#allocation7 + $0x724] ss:$24 sps:$4 sm:$0xff]  }
 0x265   :  { %2292 = vmatprep.subr.bf16.mxu0 %v4278_v16  ;;  %2415 = vmatprep.subr.bf16.mxu1 %v4281_v17  ;;  %v4359_v15 = vld [vmem:[#allocation7 + $0x72c] ss:$24 sps:$4 sm:$0xff]   ;;  %v4354_v16 = vld [vmem:[#allocation7 + $0x720] ss:$24 sps:$4 sm:$0xff]  }
 0x266   :  { %v4357_v17 = vld [vmem:[#allocation7 + $0x728] ss:$24 sps:$4 sm:$0xff]  }
 0x268   :  { %2293 = vmatpush1.bf16.msra.mxu0 %v4276_v18  ;;  %2416 = vmatpush1.bf16.msra.mxu1 %v4279_v19  ;;  %v4362_v18 = vld [vmem:[#allocation7 + $0x754] ss:$24 sps:$4 sm:$0xff]  }
 0x269   :  { %2294 = vmatprep.subr.bf16.mxu0 %v4284_v20  ;;  %2417 = vmatprep.subr.bf16.mxu1 %v4287_v21  ;;  %v4365_v19 = vld [vmem:[#allocation7 + $0x75c] ss:$24 sps:$4 sm:$0xff]   ;;  %v4360_v20 = vld [vmem:[#allocation7 + $0x750] ss:$24 sps:$4 sm:$0xff]  }
 0x26a   :  { %v4363_v21 = vld [vmem:[#allocation7 + $0x758] ss:$24 sps:$4 sm:$0xff]  }
 0x26c   :  { %2295 = vmatpush1.bf16.msra.mxu0 %v4282_v22  ;;  %2418 = vmatpush1.bf16.msra.mxu1 %v4285_v23  ;;  %v4368_v22 = vld [vmem:[#allocation7 + $0x784] ss:$24 sps:$4 sm:$0xff]  }
 0x26d   :  { %2296 = vmatprep.subr.bf16.mxu0 %v4290_v24  ;;  %2419 = vmatprep.subr.bf16.mxu1 %v4293_v25  ;;  %v4371_v23 = vld [vmem:[#allocation7 + $0x78c] ss:$24 sps:$4 sm:$0xff]   ;;  %v4366_v24 = vld [vmem:[#allocation7 + $0x780] ss:$24 sps:$4 sm:$0xff]  }
 0x26e   :  { %v4369_v25 = vld [vmem:[#allocation7 + $0x788] ss:$24 sps:$4 sm:$0xff]  }
 0x270   :  { %2297 = vmatpush1.bf16.msra.mxu0 %v4288_v26  ;;  %2420 = vmatpush1.bf16.msra.mxu1 %v4291_v27  ;;  %v4374_v26 = vld [vmem:[#allocation7 + $0x7b4] ss:$24 sps:$4 sm:$0xff]  }
 0x271   :  { %2298 = vmatprep.subr.bf16.mxu0 %v4296_v28  ;;  %2421 = vmatprep.subr.bf16.mxu1 %v4299_v29  ;;  %v4377_v27 = vld [vmem:[#allocation7 + $0x7bc] ss:$24 sps:$4 sm:$0xff]   ;;  %v4372_v28 = vld [vmem:[#allocation7 + $0x7b0] ss:$24 sps:$4 sm:$0xff]  }
 0x272   :  { %v4375_v29 = vld [vmem:[#allocation7 + $0x7b8] ss:$24 sps:$4 sm:$0xff]  }
 0x274   :  { %2299 = vmatpush1.bf16.msra.mxu0 %v4294_v30  ;;  %2422 = vmatpush1.bf16.msra.mxu1 %v4297_v31  ;;  %v4380_v30 = vld [vmem:[#allocation7 + $0x7e4] ss:$24 sps:$4 sm:$0xff]  }
 0x275   :  { %2300 = vmatprep.subr.bf16.mxu0 %v4302_v32  ;;  %2423 = vmatprep.subr.bf16.mxu1 %v4305_v33  ;;  %v4383_v31 = vld [vmem:[#allocation7 + $0x7ec] ss:$24 sps:$4 sm:$0xff]   ;;  %v4378_v32 = vld [vmem:[#allocation7 + $0x7e0] ss:$24 sps:$4 sm:$0xff]  }
 0x276   :  { %v4381_v33 = vld [vmem:[#allocation7 + $0x7e8] ss:$24 sps:$4 sm:$0xff]  }
 0x278   :  { %2301 = vmatpush1.bf16.msra.mxu0 %v4300_v34  ;;  %2424 = vmatpush1.bf16.msra.mxu1 %v4303_v35  ;;  %v4386_v34 = vld [vmem:[#allocation7 + $0x814] ss:$24 sps:$4 sm:$0xff]  }
 0x279   :  { %2302 = vmatprep.subr.bf16.mxu0 %v4308_v36  ;;  %2425 = vmatprep.subr.bf16.mxu1 %v4311_v37  ;;  %v4389_v35 = vld [vmem:[#allocation7 + $0x81c] ss:$24 sps:$4 sm:$0xff]   ;;  %v4384_v36 = vld [vmem:[#allocation7 + $0x810] ss:$24 sps:$4 sm:$0xff]  }
 0x27a   :  { %v4387_v37 = vld [vmem:[#allocation7 + $0x818] ss:$24 sps:$4 sm:$0xff]  }
 0x27c   :  { %2303 = vmatpush1.bf16.msra.mxu0 %v4306_v38  ;;  %2426 = vmatpush1.bf16.msra.mxu1 %v4309_v40  ;;  %v4392_v38 = vld [vmem:[#allocation7 + $0x844] ss:$24 sps:$4 sm:$0xff]  }
 0x27d   :  { %2304 = vmatprep.subr.bf16.mxu0 %v4314_v41  ;;  %2427 = vmatprep.subr.bf16.mxu1 %v4317_v42  ;;  %v4395_v40 = vld [vmem:[#allocation7 + $0x84c] ss:$24 sps:$4 sm:$0xff]   ;;  %v4390_v41 = vld [vmem:[#allocation7 + $0x840] ss:$24 sps:$4 sm:$0xff]  }
 0x27e   :  { %v4393_v42 = vld [vmem:[#allocation7 + $0x848] ss:$24 sps:$4 sm:$0xff]  }
 0x280   :  { %2305 = vmatpush1.bf16.msra.mxu0 %v4312_v47  ;;  %2428 = vmatpush1.bf16.msra.mxu1 %v4315_v48  ;;  %v4396_v47 = vld [vmem:[#allocation7 + $0x870] ss:$24 sps:$4 sm:$0xff]  }
 0x281   :  { %2315 = vmatprep.subr.bf16.mxu0 %v4320_v51  ;;  %2438 = vmatprep.subr.bf16.mxu1 %v4323_v52  ;;  %v4399_v48 = vld [vmem:[#allocation7 + $0x878] ss:$24 sps:$4 sm:$0xff]   ;;  %v4407_v51 = vld [vmem:[#allocation7 + $0x8ac] ss:$24 sps:$4 sm:$0xff]  }
 0x282   :  { %v4402_v52 = vld [vmem:[#allocation7 + $0x8a0] ss:$24 sps:$4 sm:$0xff]  }
 0x283   :  { %2307 = vmatmul.mubr.bf16.vlgmr.msra.gmra.mrb[0].mxu0 %v5184_v55  ;;  %2430 = vmatmul.mubr.bf16.vlgmr.msra.gmra.mrb[0].mxu1 %v5184_v55 }
 0x284   :  { %2316 = vmatpush1.bf16.msra.mxu0 %v4318_v54  ;;  %2347 = vmatprep.mubr.bf16.mxu0 %v5186_v57  ;;  %v4410_v54 = vld [vmem:[#allocation7 + $0x8d4] ss:$24 sps:$4 sm:$0xff]  }
 0x285   :  { %2439 = vmatpush1.bf16.msra.mxu1 %v4321_v56  ;;  %2470 = vmatprep.mubr.bf16.mxu1 %v5186_v57  ;;  %v4413_v56 = vld [vmem:[#allocation7 + $0x8dc] ss:$24 sps:$4 sm:$0xff]  }
 0x286   :  { %2317 = vmatprep.subr.bf16.mxu0 %v4326_v58  ;;  %2440 = vmatprep.subr.bf16.mxu1 %v4329_v59  ;;  %v458_v58 = vld [vmem:[#allocation4 + $0x20] sm:$0xff] }
 0x287   :  { %v4408_v59 = vld [vmem:[#allocation7 + $0x8d0] ss:$24 sps:$4 sm:$0xff]  }
 0x288   :  { %2318 = vmatpush1.bf16.msra.mxu0 %v4324_v60  ;;  %v4411_v60 = vld [vmem:[#allocation7 + $0x8d8] ss:$24 sps:$4 sm:$0xff]  }
 0x289   :  { %2441 = vmatpush1.bf16.msra.mxu1 %v4327_v61  ;;  %2319 = vmatprep.subr.bf16.mxu0 %v4332_v62  ;;  %v465_v61 = vmul.f32 %v5165_v39, %v458_v58  ;;  %v4416_v62 = vld [vmem:[#allocation7 + $0x14] ss:$24 sps:$4 sm:$0xff]   ;;  %v4420_v39 = vld [vmem:[#allocation7 + $0x70] ss:$24 sps:$4 sm:$0xff]   ;;  %v4587_v58 = vld [vmem:[#allocation12 + $0x94] ss:$8 sps:$4 sm:$0xff]  }
 0x28a   :  { %2442 = vmatprep.subr.bf16.mxu1 %v4335_v63  ;;  %v4414_v63 = vld [vmem:[#allocation7 + $0x10] ss:$24 sps:$4 sm:$0xff]  }
 0x28c   :  { %2320 = vmatpush1.bf16.msra.mxu0 %v4330_v0  ;;  %v5193_v0 = vpack.c.bf16 %v465_v61, %v465_v61  ;;  %v4585_v61 = vld [vmem:[#allocation12 + $0x90] ss:$8 sps:$4 sm:$0xff]  }
 0x28d   :  { %2443 = vmatpush1.bf16.msra.mxu1 %v4333_v1  ;;  %2321 = vmatprep.subr.bf16.mxu0 %v4338_v2  ;;  %v4419_v1 = vld [vmem:[#allocation7 + $0x44] ss:$24 sps:$4 sm:$0xff]   ;;  %v4417_v2 = vld [vmem:[#allocation7 + $0x40] ss:$24 sps:$4 sm:$0xff]  }
 0x28e   :  { %2444 = vmatprep.subr.bf16.mxu1 %v4341_v3  ;;  %v4422_v3 = vld [vmem:[#allocation7 + $0x74] ss:$24 sps:$4 sm:$0xff]  }
 0x290   :  { %2322 = vmatpush1.bf16.msra.mxu0 %v4336_v4  ;;  %v4425_v4 = vld [vmem:[#allocation7 + $0xa4] ss:$24 sps:$4 sm:$0xff]  }
 0x291   :  { %2445 = vmatpush1.bf16.msra.mxu1 %v4339_v5  ;;  %2323 = vmatprep.subr.bf16.mxu0 %v4344_v6  ;;  %v4423_v5 = vld [vmem:[#allocation7 + $0xa0] ss:$24 sps:$4 sm:$0xff]   ;;  %v4428_v6 = vld [vmem:[#allocation7 + $0xd4] ss:$24 sps:$4 sm:$0xff]  }
 0x292   :  { %2446 = vmatprep.subr.bf16.mxu1 %v4347_v7  ;;  %v4426_v7 = vld [vmem:[#allocation7 + $0xd0] ss:$24 sps:$4 sm:$0xff]  }
 0x294   :  { %2324 = vmatpush1.bf16.msra.mxu0 %v4342_v8  ;;  %v4431_v8 = vld [vmem:[#allocation7 + $0x104] ss:$24 sps:$4 sm:$0xff]  }
 0x295   :  { %2447 = vmatpush1.bf16.msra.mxu1 %v4345_v9  ;;  %2325 = vmatprep.subr.bf16.mxu0 %v4350_v10  ;;  %v4429_v9 = vld [vmem:[#allocation7 + $0x100] ss:$24 sps:$4 sm:$0xff]   ;;  %v4434_v10 = vld [vmem:[#allocation7 + $0x134] ss:$24 sps:$4 sm:$0xff]  }
 0x296   :  { %2448 = vmatprep.subr.bf16.mxu1 %v4353_v11  ;;  %v4437_v11 = vld [vmem:[#allocation7 + $0x164] ss:$24 sps:$4 sm:$0xff]  }
 0x298   :  { %2326 = vmatpush1.bf16.msra.mxu0 %v4348_v12  ;;  %v4435_v12 = vld [vmem:[#allocation7 + $0x160] ss:$24 sps:$4 sm:$0xff]  }
 0x299   :  { %2449 = vmatpush1.bf16.msra.mxu1 %v4351_v13  ;;  %2327 = vmatprep.subr.bf16.mxu0 %v4356_v14  ;;  %v4440_v13 = vld [vmem:[#allocation7 + $0x194] ss:$24 sps:$4 sm:$0xff]   ;;  %v4438_v14 = vld [vmem:[#allocation7 + $0x190] ss:$24 sps:$4 sm:$0xff]  }
 0x29a   :  { %2450 = vmatprep.subr.bf16.mxu1 %v4359_v15  ;;  %v4443_v15 = vld [vmem:[#allocation7 + $0x1c4] ss:$24 sps:$4 sm:$0xff]  }
 0x29c   :  { %2328 = vmatpush1.bf16.msra.mxu0 %v4354_v16  ;;  %v4441_v16 = vld [vmem:[#allocation7 + $0x1c0] ss:$24 sps:$4 sm:$0xff]  }
 0x29d   :  { %2451 = vmatpush1.bf16.msra.mxu1 %v4357_v17  ;;  %2329 = vmatprep.subr.bf16.mxu0 %v4362_v18  ;;  %v4446_v17 = vld [vmem:[#allocation7 + $0x1f4] ss:$24 sps:$4 sm:$0xff]  }
 0x29e   :  { %2452 = vmatprep.subr.bf16.mxu1 %v4365_v19  ;;  %v4540_v18 = vld [vmem:[#allocation12] ss:$8 sps:$4 sm:$0xff]   ;;  %v4542_v19 = vld [vmem:[#allocation12 + $0x4] ss:$8 sps:$4 sm:$0xff]  }
 0x2a0   :  { %2330 = vmatpush1.bf16.msra.mxu0 %v4360_v20  ;;  %v4444_v20 = vld [vmem:[#allocation7 + $0x1f0] ss:$24 sps:$4 sm:$0xff]  }
 0x2a1   :  { %2453 = vmatpush1.bf16.msra.mxu1 %v4363_v21  ;;  %2331 = vmatprep.subr.bf16.mxu0 %v4368_v22  ;;  %v4449_v21 = vld [vmem:[#allocation7 + $0x224] ss:$24 sps:$4 sm:$0xff]  }
 0x2a2   :  { %2454 = vmatprep.subr.bf16.mxu1 %v4371_v23  ;;  %v4546_v22 = vld [vmem:[#allocation12 + $0x10] ss:$8 sps:$4 sm:$0xff]   ;;  %v4548_v23 = vld [vmem:[#allocation12 + $0x14] ss:$8 sps:$4 sm:$0xff]  }
 0x2a4   :  { %2332 = vmatpush1.bf16.msra.mxu0 %v4366_v24  ;;  %v4447_v24 = vld [vmem:[#allocation7 + $0x220] ss:$24 sps:$4 sm:$0xff]  }
 0x2a5   :  { %2455 = vmatpush1.bf16.msra.mxu1 %v4369_v25  ;;  %2333 = vmatprep.subr.bf16.mxu0 %v4374_v26  ;;  %v4452_v25 = vld [vmem:[#allocation7 + $0x254] ss:$24 sps:$4 sm:$0xff]  }
 0x2a6   :  { %2456 = vmatprep.subr.bf16.mxu1 %v4377_v27  ;;  %v4552_v26 = vld [vmem:[#allocation12 + $0x20] ss:$8 sps:$4 sm:$0xff]   ;;  %v4554_v27 = vld [vmem:[#allocation12 + $0x24] ss:$8 sps:$4 sm:$0xff]  }
 0x2a8   :  { %2334 = vmatpush1.bf16.msra.mxu0 %v4372_v28  ;;  %v4450_v28 = vld [vmem:[#allocation7 + $0x250] ss:$24 sps:$4 sm:$0xff]  }
 0x2a9   :  { %2457 = vmatpush1.bf16.msra.mxu1 %v4375_v29  ;;  %2335 = vmatprep.subr.bf16.mxu0 %v4380_v30  ;;  %v4455_v29 = vld [vmem:[#allocation7 + $0x284] ss:$24 sps:$4 sm:$0xff]  }
 0x2aa   :  { %2458 = vmatprep.subr.bf16.mxu1 %v4383_v31  ;;  %v4558_v30 = vld [vmem:[#allocation12 + $0x30] ss:$8 sps:$4 sm:$0xff]   ;;  %v4560_v31 = vld [vmem:[#allocation12 + $0x34] ss:$8 sps:$4 sm:$0xff]  }
 0x2ac   :  { %2336 = vmatpush1.bf16.msra.mxu0 %v4378_v32  ;;  %v4453_v32 = vld [vmem:[#allocation7 + $0x280] ss:$24 sps:$4 sm:$0xff]  }
 0x2ad   :  { %2459 = vmatpush1.bf16.msra.mxu1 %v4381_v33  ;;  %2337 = vmatprep.subr.bf16.mxu0 %v4386_v34  ;;  %v4458_v33 = vld [vmem:[#allocation7 + $0x2b4] ss:$24 sps:$4 sm:$0xff]  }
 0x2ae   :  { %2460 = vmatprep.subr.bf16.mxu1 %v4389_v35  ;;  %v4564_v34 = vld [vmem:[#allocation12 + $0x40] ss:$8 sps:$4 sm:$0xff]   ;;  %v4566_v35 = vld [vmem:[#allocation12 + $0x44] ss:$8 sps:$4 sm:$0xff]  }
 0x2b0   :  { %2338 = vmatpush1.bf16.msra.mxu0 %v4384_v36  ;;  %v4456_v36 = vld [vmem:[#allocation7 + $0x2b0] ss:$24 sps:$4 sm:$0xff]  }
 0x2b1   :  { %2461 = vmatpush1.bf16.msra.mxu1 %v4387_v37  ;;  %2339 = vmatprep.subr.bf16.mxu0 %v4392_v38  ;;  %v4461_v37 = vld [vmem:[#allocation7 + $0x2e4] ss:$24 sps:$4 sm:$0xff]  }
 0x2b2   :  { %2462 = vmatprep.subr.bf16.mxu1 %v4395_v40  ;;  %v4570_v38 = vld [vmem:[#allocation12 + $0x50] ss:$8 sps:$4 sm:$0xff]   ;;  %v4572_v40 = vld [vmem:[#allocation12 + $0x54] ss:$8 sps:$4 sm:$0xff]  }
 0x2b4   :  { %2340 = vmatpush1.bf16.msra.mxu0 %v4390_v41  ;;  %v4459_v41 = vld [vmem:[#allocation7 + $0x2e0] ss:$24 sps:$4 sm:$0xff]  }
 0x2b5   :  { %2463 = vmatpush1.bf16.msra.mxu1 %v4393_v42  ;;  %2341 = vmatprep.subr.bf16.mxu0 %v4398_v43  ;;  %v4464_v42 = vld [vmem:[#allocation7 + $0x314] ss:$24 sps:$4 sm:$0xff]  }
 0x2b6   :  { %2464 = vmatprep.subr.bf16.mxu1 %v4401_v44  ;;  %v4576_v43 = vld [vmem:[#allocation12 + $0x60] ss:$8 sps:$4 sm:$0xff]   ;;  %v4578_v44 = vld [vmem:[#allocation12 + $0x64] ss:$8 sps:$4 sm:$0xff]  }
 0x2b8   :  { %2342 = vmatpush1.bf16.msra.mxu0 %v4396_v47  ;;  %v4462_v47 = vld [vmem:[#allocation7 + $0x310] ss:$24 sps:$4 sm:$0xff]  }
 0x2b9   :  { %2465 = vmatpush1.bf16.msra.mxu1 %v4399_v48  ;;  %2343 = vmatprep.subr.bf16.mxu0 %v4404_v49  ;;  %v4467_v48 = vld [vmem:[#allocation7 + $0x344] ss:$24 sps:$4 sm:$0xff]  }
 0x2ba   :  { %2466 = vmatprep.subr.bf16.mxu1 %v4407_v51  ;;  %v4581_v49 = vld [vmem:[#allocation12 + $0x74] ss:$8 sps:$4 sm:$0xff]   ;;  %v4579_v51 = vld [vmem:[#allocation12 + $0x70] ss:$8 sps:$4 sm:$0xff]  }
 0x2bc   :  { %2344 = vmatpush1.bf16.msra.mxu0 %v4402_v52  ;;  %v4584_v52 = vld [vmem:[#allocation12 + $0x84] ss:$8 sps:$4 sm:$0xff]  }
 0x2bd   :  { %2467 = vmatpush1.bf16.msra.mxu1 %v4405_v53  ;;  %2345 = vmatprep.subr.bf16.mxu0 %v4410_v54  ;;  %v4465_v53 = vld [vmem:[#allocation7 + $0x340] ss:$24 sps:$4 sm:$0xff]   ;;  %v4470_v54 = vld [vmem:[#allocation7 + $0x374] ss:$24 sps:$4 sm:$0xff]  }
 0x2be   :  { %2468 = vmatprep.subr.bf16.mxu1 %v4413_v56  ;;  %v4582_v56 = vld [vmem:[#allocation12 + $0x80] ss:$8 sps:$4 sm:$0xff]  }
 0x2c0   :  { %2346 = vmatpush1.bf16.msra.mxu0 %v4408_v59  ;;  %v4468_v59 = vld [vmem:[#allocation7 + $0x370] ss:$24 sps:$4 sm:$0xff]  }
 0x2c1   :  { %2469 = vmatpush1.bf16.msra.mxu1 %v4411_v60  ;;  %2479 = vmatprep.subr.bf16.mxu0 %v4416_v62  ;;  %v4473_v60 = vld [vmem:[#allocation7 + $0x3a4] ss:$24 sps:$4 sm:$0xff]   ;;  %v4471_v62 = vld [vmem:[#allocation7 + $0x3a0] ss:$24 sps:$4 sm:$0xff]  }
 0x2c2   :  { %3202 = vmatprep.subr.bf16.mxu1 %v4542_v19  ;;  %v4603_v19 = vld [vmem:[#allocation12 + $0xf0] ss:$8 sps:$4 sm:$0xff]  }
 0x2c3   :  { %2348 = vmatmul.mubr.bf16.vlgmr.msra.gmra.mrb[0].mxu0 %v5193_v0 }
 0x2c4   :  { %2471 = vmatmul.mubr.bf16.vlgmr.msra.gmra.mrb[0].mxu1 %v5193_v0  ;;  %2480 = vmatpush1.bf16.msra.mxu0 %v4414_v63  ;;  %v4588_v63 = vld [vmem:[#allocation12 + $0xa0] ss:$8 sps:$4 sm:$0xff]  }
 0x2c5   :  { %2511 = vmatprep.mubr.bf16.mxu0 %v5170_v45  ;;  %2481 = vmatprep.subr.bf16.mxu0 %v4419_v1  ;;  %v4432_v45 = vld [vmem:[#allocation7 + $0x130] ss:$24 sps:$4 sm:$0xff]   ;;  %v4593_v1 = vld [vmem:[#allocation12 + $0xb4] ss:$8 sps:$4 sm:$0xff]  }
 0x2c6   :  { %3203 = vmatpush1.bf16.msra.mxu1 %v4540_v18  ;;  %v4489_v18 = vld [vmem:[#allocation7 + $0x4c0] ss:$24 sps:$4 sm:$0xff]  }
 0x2c7   :  { %3204 = vmatprep.subr.bf16.mxu1 %v4548_v23  ;;  %v4497_v23 = vld [vmem:[#allocation7 + $0x524] ss:$24 sps:$4 sm:$0xff]  }
 0x2c8   :  { %2482 = vmatpush1.bf16.msra.mxu0 %v4417_v2  ;;  %v4474_v2 = vld [vmem:[#allocation7 + $0x3d0] ss:$24 sps:$4 sm:$0xff]  }
 0x2c9   :  { %2483 = vmatprep.subr.bf16.mxu0 %v4422_v3  ;;  %v4479_v3 = vld [vmem:[#allocation7 + $0x404] ss:$24 sps:$4 sm:$0xff]  }
 0x2ca   :  { %3205 = vmatpush1.bf16.msra.mxu1 %v4546_v22  ;;  %v4492_v22 = vld [vmem:[#allocation7 + $0x4f0] ss:$24 sps:$4 sm:$0xff]  }
 0x2cb   :  { %3206 = vmatprep.subr.bf16.mxu1 %v4554_v27  ;;  %v4503_v27 = vld [vmem:[#allocation7 + $0x584] ss:$24 sps:$4 sm:$0xff]  }
 0x2cc   :  { %2484 = vmatpush1.bf16.msra.mxu0 %v4420_v39  ;;  %v4591_v39 = vld [vmem:[#allocation12 + $0xb0] ss:$8 sps:$4 sm:$0xff]  }
 0x2cd   :  { %2485 = vmatprep.subr.bf16.mxu0 %v4425_v4  ;;  %v4477_v4 = vld [vmem:[#allocation7 + $0x400] ss:$24 sps:$4 sm:$0xff]  }
 0x2ce   :  { %3207 = vmatpush1.bf16.msra.mxu1 %v4552_v26  ;;  %v4498_v26 = vld [vmem:[#allocation7 + $0x550] ss:$24 sps:$4 sm:$0xff]  }
 0x2cf   :  { %3208 = vmatprep.subr.bf16.mxu1 %v4560_v31  ;;  %v4509_v31 = vld [vmem:[#allocation7 + $0x5e4] ss:$24 sps:$4 sm:$0xff]  }
 0x2d0   :  { %2486 = vmatpush1.bf16.msra.mxu0 %v4423_v5  ;;  %v4482_v5 = vld [vmem:[#allocation7 + $0x434] ss:$24 sps:$4 sm:$0xff]  }
 0x2d1   :  { %2487 = vmatprep.subr.bf16.mxu0 %v4428_v6  ;;  %v4596_v6 = vld [vmem:[#allocation12 + $0xc4] ss:$8 sps:$4 sm:$0xff]  }
 0x2d2   :  { %3209 = vmatpush1.bf16.msra.mxu1 %v4558_v30  ;;  %v4504_v30 = vld [vmem:[#allocation7 + $0x5b0] ss:$24 sps:$4 sm:$0xff]  }
 0x2d3   :  { %3210 = vmatprep.subr.bf16.mxu1 %v4566_v35  ;;  %v4515_v35 = vld [vmem:[#allocation7 + $0x644] ss:$24 sps:$4 sm:$0xff]  }
 0x2d4   :  { %2488 = vmatpush1.bf16.msra.mxu0 %v4426_v7  ;;  %v4480_v7 = vld [vmem:[#allocation7 + $0x430] ss:$24 sps:$4 sm:$0xff]  }
 0x2d5   :  { %2489 = vmatprep.subr.bf16.mxu0 %v4431_v8  ;;  %v4594_v8 = vld [vmem:[#allocation12 + $0xc0] ss:$8 sps:$4 sm:$0xff]  }
 0x2d6   :  { %3211 = vmatpush1.bf16.msra.mxu1 %v4564_v34  ;;  %v4510_v34 = vld [vmem:[#allocation7 + $0x610] ss:$24 sps:$4 sm:$0xff]  }
 0x2d7   :  { %3212 = vmatprep.subr.bf16.mxu1 %v4572_v40  ;;  %v4521_v40 = vld [vmem:[#allocation7 + $0x6a4] ss:$24 sps:$4 sm:$0xff]  }
 0x2d8   :  { %2490 = vmatpush1.bf16.msra.mxu0 %v4429_v9  ;;  %v4485_v9 = vld [vmem:[#allocation7 + $0x464] ss:$24 sps:$4 sm:$0xff]  }
 0x2d9   :  { %2491 = vmatprep.subr.bf16.mxu0 %v4434_v10  ;;  %v4599_v10 = vld [vmem:[#allocation12 + $0xd4] ss:$8 sps:$4 sm:$0xff]  }
 0x2da   :  { %3213 = vmatpush1.bf16.msra.mxu1 %v4570_v38  ;;  %v4516_v38 = vld [vmem:[#allocation7 + $0x670] ss:$24 sps:$4 sm:$0xff]  }
 0x2db   :  { %3214 = vmatprep.subr.bf16.mxu1 %v4578_v44  ;;  %v4527_v44 = vld [vmem:[#allocation7 + $0x704] ss:$24 sps:$4 sm:$0xff]  }
 0x2dc   :  { %2492 = vmatpush1.bf16.msra.mxu0 %v4432_v45  ;;  %v4483_v45 = vld [vmem:[#allocation7 + $0x460] ss:$24 sps:$4 sm:$0xff]  }
 0x2dd   :  { %2493 = vmatprep.subr.bf16.mxu0 %v4437_v11  ;;  %v4597_v11 = vld [vmem:[#allocation12 + $0xd0] ss:$8 sps:$4 sm:$0xff]  }
 0x2de   :  { %3215 = vmatpush1.bf16.msra.mxu1 %v4576_v43  ;;  %v4522_v43 = vld [vmem:[#allocation7 + $0x6d0] ss:$24 sps:$4 sm:$0xff]  }
 0x2df   :  { %3216 = vmatprep.subr.bf16.mxu1 %v4581_v49  ;;  %v4531_v49 = vld [vmem:[#allocation7 + $0x760] ss:$24 sps:$4 sm:$0xff]  }
 0x2e0   :  { %2494 = vmatpush1.bf16.msra.mxu0 %v4435_v12  ;;  %v4488_v12 = vld [vmem:[#allocation7 + $0x494] ss:$24 sps:$4 sm:$0xff]  }
 0x2e1   :  { %2495 = vmatprep.subr.bf16.mxu0 %v4440_v13  ;;  %v4602_v13 = vld [vmem:[#allocation12 + $0xe4] ss:$8 sps:$4 sm:$0xff]  }
 0x2e2   :  { %3217 = vmatpush1.bf16.msra.mxu1 %v4579_v51  ;;  %v4536_v51 = vld [vmem:[#allocation7 + $0x794] ss:$24 sps:$4 sm:$0xff]  }
 0x2e3   :  { %3218 = vmatprep.subr.bf16.mxu1 %v4584_v52  ;;  %v4534_v52 = vld [vmem:[#allocation7 + $0x790] ss:$24 sps:$4 sm:$0xff]  }
 0x2e4   :  { %2496 = vmatpush1.bf16.msra.mxu0 %v4438_v14  ;;  %v4486_v14 = vld [vmem:[#allocation7 + $0x490] ss:$24 sps:$4 sm:$0xff]  }
 0x2e5   :  { %2497 = vmatprep.subr.bf16.mxu0 %v4443_v15  ;;  %v4600_v15 = vld [vmem:[#allocation12 + $0xe0] ss:$8 sps:$4 sm:$0xff]  }
 0x2e6   :  { %3219 = vmatpush1.bf16.msra.mxu1 %v4582_v56  ;;  %v4545_v56 = vld [vmem:[#allocation7 + $0x7f4] ss:$24 sps:$4 sm:$0xff]  }
 0x2e7   :  { %3220 = vmatprep.subr.bf16.mxu1 %v4587_v58  ;;  %v4543_v58 = vld [vmem:[#allocation7 + $0x7f0] ss:$24 sps:$4 sm:$0xff]  }
 0x2e8   :  { %2498 = vmatpush1.bf16.msra.mxu0 %v4441_v16  ;;  %v4491_v16 = vld [vmem:[#allocation7 + $0x4c4] ss:$24 sps:$4 sm:$0xff]  }
 0x2e9   :  { %2499 = vmatprep.subr.bf16.mxu0 %v4446_v17  ;;  %v4605_v17 = vld [vmem:[#allocation12 + $0xf4] ss:$8 sps:$4 sm:$0xff]  }
 0x2ea   :  { %3221 = vmatpush1.bf16.msra.mxu1 %v4585_v61  ;;  %v4557_v61 = vld [vmem:[#allocation7 + $0x854] ss:$24 sps:$4 sm:$0xff]  }
 0x2ec   :  { %2500 = vmatpush1.bf16.msra.mxu0 %v4444_v20  ;;  %v4494_v20 = vld [vmem:[#allocation7 + $0x4f4] ss:$24 sps:$4 sm:$0xff]  }
 0x2ed   :  { %2501 = vmatprep.subr.bf16.mxu0 %v4449_v21  ;;  %v4608_v21 = vld [vmem:[#allocation12 + $0x104] ss:$8 sps:$4 sm:$0xff]  }
 0x2f0   :  { %2502 = vmatpush1.bf16.msra.mxu0 %v4447_v24  ;;  %v4495_v24 = vld [vmem:[#allocation7 + $0x520] ss:$24 sps:$4 sm:$0xff]  }
 0x2f1   :  { %2503 = vmatprep.subr.bf16.mxu0 %v4452_v25  ;;  %v4500_v25 = vld [vmem:[#allocation7 + $0x554] ss:$24 sps:$4 sm:$0xff]  }
 0x2f4   :  { %2504 = vmatpush1.bf16.msra.mxu0 %v4450_v28  ;;  %v4501_v28 = vld [vmem:[#allocation7 + $0x580] ss:$24 sps:$4 sm:$0xff]  }
 0x2f5   :  { %2505 = vmatprep.subr.bf16.mxu0 %v4455_v29  ;;  %v4506_v29 = vld [vmem:[#allocation7 + $0x5b4] ss:$24 sps:$4 sm:$0xff]  }
 0x2f8   :  { %2506 = vmatpush1.bf16.msra.mxu0 %v4453_v32  ;;  %v4507_v32 = vld [vmem:[#allocation7 + $0x5e0] ss:$24 sps:$4 sm:$0xff]  }
 0x2f9   :  { %2507 = vmatprep.subr.bf16.mxu0 %v4458_v33  ;;  %v4512_v33 = vld [vmem:[#allocation7 + $0x614] ss:$24 sps:$4 sm:$0xff]  }
 0x2fc   :  { %2508 = vmatpush1.bf16.msra.mxu0 %v4456_v36  ;;  %v4513_v36 = vld [vmem:[#allocation7 + $0x640] ss:$24 sps:$4 sm:$0xff]  }
 0x2fd   :  { %2509 = vmatprep.subr.bf16.mxu0 %v4461_v37  ;;  %v4518_v37 = vld [vmem:[#allocation7 + $0x674] ss:$24 sps:$4 sm:$0xff]  }
 0x300   :  { %2510 = vmatpush1.bf16.msra.mxu0 %v4459_v41  ;;  %v4519_v41 = vld [vmem:[#allocation7 + $0x6a0] ss:$24 sps:$4 sm:$0xff]  }
 0x301   :  { %2520 = vmatprep.subr.bf16.mxu0 %v4464_v42  ;;  %v4524_v42 = vld [vmem:[#allocation7 + $0x6d4] ss:$24 sps:$4 sm:$0xff]  }
 0x303   :  { %2512 = vmatmul.mubr.bf16.vlgmr.msra.gmra.mrb[4].mxu0 %v5172_v46  ;;  %v4590_v46 = vld [vmem:[#allocation12 + $0xa4] ss:$8 sps:$4 sm:$0xff]  }
 0x304   :  { %2521 = vmatpush1.bf16.msra.mxu0 %v4462_v47  ;;  %2552 = vmatprep.mubr.bf16.mxu0 %v5178_v50  ;;  %v4476_v50 = vld [vmem:[#allocation7 + $0x3d4] ss:$24 sps:$4 sm:$0xff]  }
 0x305   :  { %2522 = vmatprep.subr.bf16.mxu0 %v4467_v48  ;;  %3222 = vmatprep.subr.bf16.mxu1 %v4590_v46  ;;  %v4530_v47 = vld [vmem:[#allocation7 + $0x734] ss:$24 sps:$4 sm:$0xff]   ;;  %v4533_v48 = vld [vmem:[#allocation7 + $0x764] ss:$24 sps:$4 sm:$0xff]   ;;  %v4555_v46 = vld [vmem:[#allocation7 + $0x850] ss:$24 sps:$4 sm:$0xff]  }
 0x306   :  { %3223 = vmatpush1.bf16.msra.mxu1 %v4588_v63  ;;  %v4569_v63 = vld [vmem:[#allocation7 + $0x8b4] ss:$24 sps:$4 sm:$0xff]  }
 0x307   :  { %3224 = vmatprep.subr.bf16.mxu1 %v4593_v1  ;;  %v4567_v1 = vld [vmem:[#allocation7 + $0x8b0] ss:$24 sps:$4 sm:$0xff]  }
 0x308   :  { %2523 = vmatpush1.bf16.msra.mxu0 %v4465_v53  ;;  %v4539_v53 = vld [vmem:[#allocation7 + $0x7c4] ss:$24 sps:$4 sm:$0xff]  }
 0x309   :  { %2524 = vmatprep.subr.bf16.mxu0 %v4470_v54  ;;  %v4537_v54 = vld [vmem:[#allocation7 + $0x7c0] ss:$24 sps:$4 sm:$0xff]  }
 0x30a   :  { %3225 = vmatpush1.bf16.msra.mxu1 %v4591_v39  ;;  %v763_v39 = vlaneseq }
 0x30b   :  { %3226 = vmatprep.subr.bf16.mxu1 %v4596_v6  ;;  %v5206_v6 = vld [vmem:[#allocation10] sm:$0x3f] }
 0x30c   :  { %2525 = vmatpush1.bf16.msra.mxu0 %v4468_v59  ;;  %v4551_v59 = vld [vmem:[#allocation7 + $0x824] ss:$24 sps:$4 sm:$0xff]  }
 0x30d   :  { %2526 = vmatprep.subr.bf16.mxu0 %v4473_v60  ;;  %v4549_v60 = vld [vmem:[#allocation7 + $0x820] ss:$24 sps:$4 sm:$0xff]  }
 0x30e   :  { %3227 = vmatpush1.bf16.msra.mxu1 %v4594_v8 }
 0x30f   :  { %3228 = vmatprep.subr.bf16.mxu1 %v4599_v10 }
 0x310   :  { %2527 = vmatpush1.bf16.msra.mxu0 %v4471_v62  ;;  %v4563_v62 = vld [vmem:[#allocation7 + $0x884] ss:$24 sps:$4 sm:$0xff]  }
 0x311   :  { %2528 = vmatprep.subr.bf16.mxu0 %v4476_v50  ;;  %v4561_v50 = vld [vmem:[#allocation7 + $0x880] ss:$24 sps:$4 sm:$0xff]  }
 0x312   :  { %3229 = vmatpush1.bf16.msra.mxu1 %v4597_v11 }
 0x313   :  { %3230 = vmatprep.subr.bf16.mxu1 %v4602_v13 }
 0x314   :  { %2529 = vmatpush1.bf16.msra.mxu0 %v4474_v2  ;;  %v4575_v2 = vld [vmem:[#allocation7 + $0x8e4] ss:$24 sps:$4 sm:$0xff]  }
 0x315   :  { %2530 = vmatprep.subr.bf16.mxu0 %v4479_v3  ;;  %v4573_v3 = vld [vmem:[#allocation7 + $0x8e0] ss:$24 sps:$4 sm:$0xff]  }
 0x316   :  { %3231 = vmatpush1.bf16.msra.mxu1 %v4600_v15 }
 0x317   :  { %3232 = vmatprep.subr.bf16.mxu1 %v4605_v17 }
 0x318   :  { %2531 = vmatpush1.bf16.msra.mxu0 %v4477_v4  ;;  %v5203_v4 = vshrl.u32 %v763_v39, 7  ;;  %v4659_v39 = vld [vmem:[#allocation12 + $0x214] ss:$8 sps:$4 sm:$0xff]  }
 0x319   :  { %2532 = vmatprep.subr.bf16.mxu0 %v4482_v5 }
 0x31a   :  { %3233 = vmatpush1.bf16.msra.mxu1 %v4603_v19  ;;  %v765_v5 = vsub.s32 0, %v5203_v4  ;;  %v777_v8 = vsub.s32 3, %v5203_v4 }
 0x31b   :  { %3243 = vmatprep.subr.bf16.mxu1 %v4608_v21 }
 0x31c   :  { %2533 = vmatpush1.bf16.msra.mxu0 %v4480_v7  ;;  %v769_v7 = vsub.s32 1, %v5203_v4 }
 0x31d   :  { %2534 = vmatprep.subr.bf16.mxu0 %v4485_v9  ;;  %v766_v9 = vrot.slane %v5206_v6, %v765_v5 }
 0x31e   :  { %v770_v10 = vrot.slane %v5206_v6, %v769_v7 }
 0x320   :  { %2535 = vmatpush1.bf16.msra.mxu0 %v4483_v45 }
 0x321   :  { %2536 = vmatprep.subr.bf16.mxu0 %v4488_v12 }
 0x324   :  { %2537 = vmatpush1.bf16.msra.mxu0 %v4486_v14 }
 0x325   :  { %2538 = vmatprep.subr.bf16.mxu0 %v4491_v16 }
 0x328   :  { %2539 = vmatpush1.bf16.msra.mxu0 %v4489_v18 }
 0x329   :  { %2540 = vmatprep.subr.bf16.mxu0 %v4494_v20 }
 0x32c   :  { %2541 = vmatpush1.bf16.msra.mxu0 %v4492_v22 }
 0x32d   :  { %2542 = vmatprep.subr.bf16.mxu0 %v4497_v23 }
 0x330   :  { %2543 = vmatpush1.bf16.msra.mxu0 %v4495_v24 }
 0x331   :  { %2544 = vmatprep.subr.bf16.mxu0 %v4500_v25  ;;  %v4606_v25 = vld [vmem:[#allocation12 + $0x100] ss:$8 sps:$4 sm:$0xff]  }
 0x334   :  { %2545 = vmatpush1.bf16.msra.mxu0 %v4498_v26 }
 0x335   :  { %2546 = vmatprep.subr.bf16.mxu0 %v4503_v27  ;;  %v4611_v27 = vld [vmem:[#allocation12 + $0x114] ss:$8 sps:$4 sm:$0xff]  }
 0x338   :  { %2547 = vmatpush1.bf16.msra.mxu0 %v4501_v28 }
 0x339   :  { %2548 = vmatprep.subr.bf16.mxu0 %v4506_v29  ;;  %v4609_v29 = vld [vmem:[#allocation12 + $0x110] ss:$8 sps:$4 sm:$0xff]  }
 0x33c   :  { %2549 = vmatpush1.bf16.msra.mxu0 %v4504_v30  ;;  %v4614_v30 = vld [vmem:[#allocation12 + $0x124] ss:$8 sps:$4 sm:$0xff]  }
 0x33d   :  { %2550 = vmatprep.subr.bf16.mxu0 %v4509_v31  ;;  %v4612_v31 = vld [vmem:[#allocation12 + $0x120] ss:$8 sps:$4 sm:$0xff]  }
 0x340   :  { %2551 = vmatpush1.bf16.msra.mxu0 %v4507_v32  ;;  %v4617_v32 = vld [vmem:[#allocation12 + $0x134] ss:$8 sps:$4 sm:$0xff]  }
 0x341   :  { %2561 = vmatprep.subr.bf16.mxu0 %v4512_v33  ;;  %v4615_v33 = vld [vmem:[#allocation12 + $0x130] ss:$8 sps:$4 sm:$0xff]  }
 0x343   :  { %2553 = vmatmul.mubr.bf16.vlgmr.msra.gmra.mrb[4].mxu0 %v5184_v55  ;;  %v4525_v55 = vld [vmem:[#allocation7 + $0x700] ss:$24 sps:$4 sm:$0xff]  }
 0x344   :  { %2562 = vmatpush1.bf16.msra.mxu0 %v4510_v34  ;;  %2593 = vmatprep.mubr.bf16.mxu0 %v5186_v57  ;;  %v4528_v57 = vld [vmem:[#allocation7 + $0x730] ss:$24 sps:$4 sm:$0xff]  }
 0x345   :  { %2563 = vmatprep.subr.bf16.mxu0 %v4515_v35  ;;  %v4620_v34 = vld [vmem:[#allocation12 + $0x144] ss:$8 sps:$4 sm:$0xff]   ;;  %v4618_v35 = vld [vmem:[#allocation12 + $0x140] ss:$8 sps:$4 sm:$0xff]  }
 0x348   :  { %2564 = vmatpush1.bf16.msra.mxu0 %v4513_v36  ;;  %v4623_v36 = vld [vmem:[#allocation12 + $0x154] ss:$8 sps:$4 sm:$0xff]  }
 0x349   :  { %2565 = vmatprep.subr.bf16.mxu0 %v4518_v37  ;;  %v4621_v37 = vld [vmem:[#allocation12 + $0x150] ss:$8 sps:$4 sm:$0xff]  }
 0x34c   :  { %2566 = vmatpush1.bf16.msra.mxu0 %v4516_v38  ;;  %v4626_v38 = vld [vmem:[#allocation12 + $0x164] ss:$8 sps:$4 sm:$0xff]  }
 0x34d   :  { %2567 = vmatprep.subr.bf16.mxu0 %v4521_v40  ;;  %v4624_v40 = vld [vmem:[#allocation12 + $0x160] ss:$8 sps:$4 sm:$0xff]  }
 0x350   :  { %2568 = vmatpush1.bf16.msra.mxu0 %v4519_v41  ;;  %v4629_v41 = vld [vmem:[#allocation12 + $0x174] ss:$8 sps:$4 sm:$0xff]  }
 0x351   :  { %2569 = vmatprep.subr.bf16.mxu0 %v4524_v42  ;;  %v4627_v42 = vld [vmem:[#allocation12 + $0x170] ss:$8 sps:$4 sm:$0xff]  }
 0x354   :  { %2570 = vmatpush1.bf16.msra.mxu0 %v4522_v43  ;;  %v4632_v43 = vld [vmem:[#allocation12 + $0x184] ss:$8 sps:$4 sm:$0xff]  }
 0x355   :  { %2571 = vmatprep.subr.bf16.mxu0 %v4527_v44  ;;  %v4630_v44 = vld [vmem:[#allocation12 + $0x180] ss:$8 sps:$4 sm:$0xff]  }
 0x358   :  { %2572 = vmatpush1.bf16.msra.mxu0 %v4525_v55  ;;  %v4635_v55 = vld [vmem:[#allocation12 + $0x194] ss:$8 sps:$4 sm:$0xff]  }
 0x359   :  { %2573 = vmatprep.subr.bf16.mxu0 %v4530_v47  ;;  %v4633_v47 = vld [vmem:[#allocation12 + $0x190] ss:$8 sps:$4 sm:$0xff]  }
 0x35c   :  { %2574 = vmatpush1.bf16.msra.mxu0 %v4528_v57  ;;  %v4638_v57 = vld [vmem:[#allocation12 + $0x1a4] ss:$8 sps:$4 sm:$0xff]  }
 0x35d   :  { %2575 = vmatprep.subr.bf16.mxu0 %v4533_v48  ;;  %v773_v48 = vsub.s32 2, %v5203_v4 }
 0x360   :  { %2576 = vmatpush1.bf16.msra.mxu0 %v4531_v49  ;;  %v4636_v49 = vld [vmem:[#allocation12 + $0x1a0] ss:$8 sps:$4 sm:$0xff]  }
 0x361   :  { %2577 = vmatprep.subr.bf16.mxu0 %v4536_v51  ;;  %v4641_v51 = vld [vmem:[#allocation12 + $0x1b4] ss:$8 sps:$4 sm:$0xff]  }
 0x364   :  { %2578 = vmatpush1.bf16.msra.mxu0 %v4534_v52  ;;  %v774_v52 = vrot.slane %v5206_v6, %v773_v48  ;;  %v781_v48 = vsub.s32 4, %v5203_v4 }
 0x365   :  { %2579 = vmatprep.subr.bf16.mxu0 %v4539_v53  ;;  %v4639_v53 = vld [vmem:[#allocation12 + $0x1b0] ss:$8 sps:$4 sm:$0xff]  }
 0x368   :  { %2580 = vmatpush1.bf16.msra.mxu0 %v4537_v54  ;;  %v4644_v54 = vld [vmem:[#allocation12 + $0x1c4] ss:$8 sps:$4 sm:$0xff]  }
 0x369   :  { %2581 = vmatprep.subr.bf16.mxu0 %v4545_v56 }
 0x36c   :  { %2582 = vmatpush1.bf16.msra.mxu0 %v4543_v58  ;;  %v4642_v58 = vld [vmem:[#allocation12 + $0x1c0] ss:$8 sps:$4 sm:$0xff]  }
 0x36d   :  { %2583 = vmatprep.subr.bf16.mxu0 %v4551_v59  ;;  %v4647_v59 = vld [vmem:[#allocation12 + $0x1d4] ss:$8 sps:$4 sm:$0xff]  }
 0x370   :  { %2584 = vmatpush1.bf16.msra.mxu0 %v4549_v60  ;;  %v4645_v60 = vld [vmem:[#allocation12 + $0x1d0] ss:$8 sps:$4 sm:$0xff]  }
 0x371   :  { %2585 = vmatprep.subr.bf16.mxu0 %v4557_v61  ;;  %v4650_v61 = vld [vmem:[#allocation12 + $0x1e4] ss:$8 sps:$4 sm:$0xff]  }
 0x374   :  { %2586 = vmatpush1.bf16.msra.mxu0 %v4555_v46  ;;  %v4648_v46 = vld [vmem:[#allocation12 + $0x1e0] ss:$8 sps:$4 sm:$0xff]  }
 0x375   :  { %2587 = vmatprep.subr.bf16.mxu0 %v4563_v62  ;;  %v4653_v62 = vld [vmem:[#allocation12 + $0x1f4] ss:$8 sps:$4 sm:$0xff]  }
 0x378   :  { %2588 = vmatpush1.bf16.msra.mxu0 %v4561_v50  ;;  %v4651_v50 = vld [vmem:[#allocation12 + $0x1f0] ss:$8 sps:$4 sm:$0xff]  }
 0x379   :  { %2589 = vmatprep.subr.bf16.mxu0 %v4569_v63  ;;  %v4656_v63 = vld [vmem:[#allocation12 + $0x204] ss:$8 sps:$4 sm:$0xff]  }
 0x37c   :  { %2590 = vmatpush1.bf16.msra.mxu0 %v4567_v1 }
 0x37d   :  { %2591 = vmatprep.subr.bf16.mxu0 %v4575_v2  ;;  %v4654_v2 = vld [vmem:[#allocation12 + $0x200] ss:$8 sps:$4 sm:$0xff]  }
 0x380   :  { %2592 = vmatpush1.bf16.msra.mxu0 %v4573_v3 }
 0x383   :  { %2594 = vmatmul.mubr.bf16.vlgmr.msra.gmra.mrb[4].mxu0 %v5193_v0  ;;  %v778_v0 = vrot.slane %v5206_v6, %v777_v8  ;;  %v4702_v8 = vld [vmem:[#allocation15 + $0x40] sm:$0xff]  }
 0x384   :  { %4022 = vmatprep.subr.bf16.mxu0 %v4702_v8 }
 0x396   :  { %v2349_v45 = vpop.f32.mrb[0].mxu0 }
 0x397   :  { %v4044_v11 = vadd.f32 %v2349_v45, %v766_v9  ;;  %v5217_v12 = vpop.f32.mrb[0].mxu1  ;;  %v2351_v13 = vpop.f32.mrb[1].mxu0  ;;  %v4703_v9 = vld [vmem:[#allocation15] sm:$0xff]  }
 0x398   :  { %v4045_v14 = vadd.f32 %v2351_v13, %v770_v10  ;;  %v2474_v15 = vpop.f32.mrb[1].mxu1  ;;  %v2353_v16 = vpop.f32.mrb[2].mxu0  ;;  %v4046_v56 = vadd.f32 %v5217_v12, %v774_v52  ;;  %v4704_v10 = vld [vmem:[#allocation15 + $0x48] sm:$0xff]   ;;  %4023 = vmatpush3.bf16.msra.mxu0 %v4703_v9  ;;  %v4706_v12 = vld [vmem:[#allocation15 + $0x50] sm:$0xff]  }
 0x399   :  { %v4047_v17 = vadd.f32 %v2474_v15, %v778_v0  ;;  %v2476_v18 = vpop.f32.mrb[2].mxu1  ;;  %v2354_v19 = vpop.f32.mrb[3].mxu0  ;;  %4720 = vtanh.f32 %v4044_v11  ;;  %v4657_v0 = vld [vmem:[#allocation12 + $0x210] ss:$8 sps:$4 sm:$0xff]   ;;  %v4662_v45 = vld [vmem:[#allocation12 + $0x224] ss:$8 sps:$4 sm:$0xff]   ;;  %4024 = vmatprep.subr.bf16.mxu0 %v4704_v10 }
 0x39a   :  { %v2477_v20 = vpop.f32.mrb[3].mxu1  ;;  %4722 = vtanh.f32 %v4045_v14  ;;  %v4705_v11 = vld [vmem:[#allocation15 + $0x8] sm:$0xff]   ;;  %v4665_v14 = vld [vmem:[#allocation12 + $0x234] ss:$8 sps:$4 sm:$0xff]  }
 0x39b   :  { %4724 = vtanh.f32 %v4047_v17  ;;  %v4660_v13 = vld [vmem:[#allocation12 + $0x220] ss:$8 sps:$4 sm:$0xff]   ;;  %v4707_v15 = vld [vmem:[#allocation15 + $0x10] sm:$0xff]   ;;  %v4668_v18 = vld [vmem:[#allocation12 + $0x244] ss:$8 sps:$4 sm:$0xff]  }
 0x39c   :  { %4726 = vtanh.f32 %v4046_v56  ;;  %4025 = vmatpush3.bf16.msra.mxu0 %v4705_v11  ;;  %v4708_v16 = vld [vmem:[#allocation15 + $0x58] sm:$0xff]   ;;  %v4710_v20 = vld [vmem:[#allocation15 + $0x60] sm:$0xff]  }
 0x39d   :  { %4026 = vmatprep.subr.bf16.mxu0 %v4706_v12  ;;  %v4663_v17 = vld [vmem:[#allocation12 + $0x230] ss:$8 sps:$4 sm:$0xff]  }
 0x39e   :  { %v4709_v19 = vld [vmem:[#allocation15 + $0x18] sm:$0xff]  }
 0x3a0   :  { %4027 = vmatpush3.bf16.msra.mxu0 %v4707_v15 }
 0x3a1   :  { %4028 = vmatprep.subr.bf16.mxu0 %v4708_v16 }
 0x3a3   :  { %v4721_v21 = vpop.eup %4720 }
 0x3a4   :  { %v4723_v22 = vpop.eup %4722  ;;  %v2608_v26 = vpack.c.bf16 %v4721_v21, %v4721_v21  ;;  %v4666_v21 = vld [vmem:[#allocation12 + $0x240] ss:$8 sps:$4 sm:$0xff]   ;;  %4029 = vmatpush3.bf16.msra.mxu0 %v4709_v19 }
 0x3a5   :  { %v4725_v23 = vpop.eup %4724  ;;  %v2609_v24 = vpack.c.bf16 %v4723_v22, %v4723_v22  ;;  %v4671_v22 = vld [vmem:[#allocation12 + $0x254] ss:$8 sps:$4 sm:$0xff]   ;;  %4030 = vmatprep.subr.bf16.mxu0 %v4710_v20  ;;  %v3997_v19 = vld [vmem:[#allocation16] ss:$0 sm:$0xff] }
 0x3a6   :  { %v2611_v28 = vpack.c.bf16 %v4725_v23, %v4725_v23  ;;  %v4727_v1 = vpop.eup %4726  ;;  %v4711_v23 = vld [vmem:[#allocation15 + $0x20] sm:$0xff]  }
 0x3a7   :  { %3234 = vmatprep.mubr.bf16.mxu1 %v2609_v24  ;;  %v2610_v3 = vpack.c.bf16 %v4727_v1, %v4727_v1  ;;  %v4712_v24 = vld [vmem:[#allocation15 + $0x68] sm:$0xff]   ;;  %v4715_v1 = vld [vmem:[#allocation15 + $0x30] sm:$0xff]  }
 0x3a8   :  { %3235 = vmatmul.mubr.bf16.vlgmr.msra.gmra.mrb[4].mxu1 %v2608_v26  ;;  %v4674_v26 = vld [vmem:[#allocation12 + $0x264] ss:$8 sps:$4 sm:$0xff]   ;;  %4031 = vmatpush3.bf16.msra.mxu0 %v4711_v23 }
 0x3a9   :  { %3244 = vmatpush1.bf16.msra.mxu1 %v4606_v25  ;;  %3275 = vmatprep.mubr.bf16.mxu1 %v2611_v28  ;;  %v4669_v25 = vld [vmem:[#allocation12 + $0x250] ss:$8 sps:$4 sm:$0xff]   ;;  %v4672_v28 = vld [vmem:[#allocation12 + $0x260] ss:$8 sps:$4 sm:$0xff]  }
 0x3aa   :  { %3245 = vmatprep.subr.bf16.mxu1 %v4611_v27  ;;  %v4713_v27 = vld [vmem:[#allocation15 + $0x28] sm:$0xff]   ;;  %4032 = vmatprep.subr.bf16.mxu0 %v4712_v24 }
 0x3ac   :  { %4033 = vmatpush3.bf16.msra.mxu0 %v4713_v27 }
 0x3ad   :  { %3246 = vmatpush1.bf16.msra.mxu1 %v4609_v29  ;;  %v4677_v29 = vld [vmem:[#allocation12 + $0x274] ss:$8 sps:$4 sm:$0xff]  }
 0x3ae   :  { %3247 = vmatprep.subr.bf16.mxu1 %v4614_v30  ;;  %v4675_v30 = vld [vmem:[#allocation12 + $0x270] ss:$8 sps:$4 sm:$0xff]  }
 0x3b1   :  { %3248 = vmatpush1.bf16.msra.mxu1 %v4612_v31  ;;  %v4680_v31 = vld [vmem:[#allocation12 + $0x284] ss:$8 sps:$4 sm:$0xff]  }
 0x3b2   :  { %3249 = vmatprep.subr.bf16.mxu1 %v4617_v32  ;;  %v4678_v32 = vld [vmem:[#allocation12 + $0x280] ss:$8 sps:$4 sm:$0xff]  }
 0x3b5   :  { %3250 = vmatpush1.bf16.msra.mxu1 %v4615_v33  ;;  %v4683_v33 = vld [vmem:[#allocation12 + $0x294] ss:$8 sps:$4 sm:$0xff]  }
 0x3b6   :  { %3251 = vmatprep.subr.bf16.mxu1 %v4620_v34  ;;  %v4681_v34 = vld [vmem:[#allocation12 + $0x290] ss:$8 sps:$4 sm:$0xff]  }
 0x3b9   :  { %3252 = vmatpush1.bf16.msra.mxu1 %v4618_v35  ;;  %v4686_v35 = vld [vmem:[#allocation12 + $0x2a4] ss:$8 sps:$4 sm:$0xff]  }
 0x3ba   :  { %3253 = vmatprep.subr.bf16.mxu1 %v4623_v36  ;;  %v4684_v36 = vld [vmem:[#allocation12 + $0x2a0] ss:$8 sps:$4 sm:$0xff]  }
 0x3bd   :  { %3254 = vmatpush1.bf16.msra.mxu1 %v4621_v37  ;;  %v4689_v37 = vld [vmem:[#allocation12 + $0x2b4] ss:$8 sps:$4 sm:$0xff]  }
 0x3be   :  { %3255 = vmatprep.subr.bf16.mxu1 %v4626_v38  ;;  %v4687_v38 = vld [vmem:[#allocation12 + $0x2b0] ss:$8 sps:$4 sm:$0xff]  }
 0x3c1   :  { %3256 = vmatpush1.bf16.msra.mxu1 %v4624_v40  ;;  %v4692_v40 = vld [vmem:[#allocation12 + $0x2c4] ss:$8 sps:$4 sm:$0xff]  }
 0x3c2   :  { %3257 = vmatprep.subr.bf16.mxu1 %v4629_v41  ;;  %v4690_v41 = vld [vmem:[#allocation12 + $0x2c0] ss:$8 sps:$4 sm:$0xff]  }
 0x3c5   :  { %3258 = vmatpush1.bf16.msra.mxu1 %v4627_v42  ;;  %v4695_v42 = vld [vmem:[#allocation12 + $0x2d4] ss:$8 sps:$4 sm:$0xff]  }
 0x3c6   :  { %3259 = vmatprep.subr.bf16.mxu1 %v4632_v43  ;;  %v4693_v43 = vld [vmem:[#allocation12 + $0x2d0] ss:$8 sps:$4 sm:$0xff]  }
 0x3c9   :  { %3260 = vmatpush1.bf16.msra.mxu1 %v4630_v44  ;;  %v4698_v44 = vld [vmem:[#allocation12 + $0x2e4] ss:$8 sps:$4 sm:$0xff]  }
 0x3ca   :  { %3261 = vmatprep.subr.bf16.mxu1 %v4635_v55  ;;  %v4696_v55 = vld [vmem:[#allocation12 + $0x2e0] ss:$8 sps:$4 sm:$0xff]  }
 0x3cd   :  { %3262 = vmatpush1.bf16.msra.mxu1 %v4633_v47  ;;  %v4701_v47 = vld [vmem:[#allocation12 + $0x2f4] ss:$8 sps:$4 sm:$0xff]  }
 0x3ce   :  { %3263 = vmatprep.subr.bf16.mxu1 %v4638_v57  ;;  %v4699_v57 = vld [vmem:[#allocation12 + $0x2f0] ss:$8 sps:$4 sm:$0xff]  }
 0x3d1   :  { %3264 = vmatpush1.bf16.msra.mxu1 %v4636_v49  ;;  %v785_v49 = vsub.s32 5, %v5203_v4 }
 0x3d2   :  { %3265 = vmatprep.subr.bf16.mxu1 %v4641_v51  ;;  %v782_v51 = vrot.slane %v5206_v6, %v781_v48 }
 0x3d3   :  { %v786_v52 = vrot.slane %v5206_v6, %v785_v49  ;;  %v4717_v6 = vld [vmem:[#allocation15 + $0x38] sm:$0xff]  }
 0x3d5   :  { %3266 = vmatpush1.bf16.msra.mxu1 %v4639_v53 }
 0x3d6   :  { %3267 = vmatprep.subr.bf16.mxu1 %v4644_v54 }
 0x3d9   :  { %3268 = vmatpush1.bf16.msra.mxu1 %v4642_v58 }
 0x3da   :  { %3269 = vmatprep.subr.bf16.mxu1 %v4647_v59 }
 0x3dd   :  { %3270 = vmatpush1.bf16.msra.mxu1 %v4645_v60 }
 0x3de   :  { %3271 = vmatprep.subr.bf16.mxu1 %v4650_v61 }
 0x3e1   :  { %3272 = vmatpush1.bf16.msra.mxu1 %v4648_v46 }
 0x3e2   :  { %3273 = vmatprep.subr.bf16.mxu1 %v4653_v62 }
 0x3e5   :  { %3274 = vmatpush1.bf16.msra.mxu1 %v4651_v50 }
 0x3e6   :  { %3284 = vmatprep.subr.bf16.mxu1 %v4656_v63  ;;  %v4714_v63 = vld [vmem:[#allocation15 + $0x70] sm:$0xff]  }
 0x3e7   :  { %4034 = vmatprep.subr.bf16.mxu0 %v4714_v63 }
 0x3e8   :  { %3276 = vmatmul.mubr.bf16.vlgmr.msra.gmra.mrb[4].mxu1 %v2610_v3  ;;  %4035 = vmatpush3.bf16.msra.mxu0 %v4715_v1  ;;  %v2710_v3 = vld [vmem:[#allocation13] sm:$0x3] }
 0x3e9   :  { %3285 = vmatpush1.bf16.msra.mxu1 %v4654_v2  ;;  %v4716_v2 = vld [vmem:[#allocation15 + $0x78] sm:$0xff]   ;;  %v2719_v8 = vrot.slane %v2710_v3, %v769_v7 }
 0x3ea   :  { %3286 = vmatprep.subr.bf16.mxu1 %v4659_v39  ;;  %4036 = vmatprep.subr.bf16.mxu0 %v4716_v2  ;;  %v2715_v39 = vrot.slane %v2710_v3, %v765_v5 }
 0x3ec   :  { %4037 = vmatpush3.bf16.msra.mxu0 %v4717_v6 }
 0x3ed   :  { %3287 = vmatpush1.bf16.msra.mxu1 %v4657_v0 }
 0x3ee   :  { %3288 = vmatprep.subr.bf16.mxu1 %v4662_v45 }
 0x3f1   :  { %3289 = vmatpush1.bf16.msra.mxu1 %v4660_v13 }
 0x3f2   :  { %3290 = vmatprep.subr.bf16.mxu1 %v4665_v14 }
 0x3f5   :  { %3291 = vmatpush1.bf16.msra.mxu1 %v4663_v17 }
 0x3f6   :  { %3292 = vmatprep.subr.bf16.mxu1 %v4668_v18 }
 0x3f9   :  { %3293 = vmatpush1.bf16.msra.mxu1 %v4666_v21 }
 0x3fa   :  { %3294 = vmatprep.subr.bf16.mxu1 %v4671_v22 }
 0x3fd   :  { %3295 = vmatpush1.bf16.msra.mxu1 %v4669_v25 }
 0x3fe   :  { %3296 = vmatprep.subr.bf16.mxu1 %v4674_v26 }
 0x401   :  { %3297 = vmatpush1.bf16.msra.mxu1 %v4672_v28 }
 0x402   :  { %3298 = vmatprep.subr.bf16.mxu1 %v4677_v29 }
 0x405   :  { %3299 = vmatpush1.bf16.msra.mxu1 %v4675_v30 }
 0x406   :  { %3300 = vmatprep.subr.bf16.mxu1 %v4680_v31 }
 0x409   :  { %3301 = vmatpush1.bf16.msra.mxu1 %v4678_v32 }
 0x40a   :  { %3302 = vmatprep.subr.bf16.mxu1 %v4683_v33 }
 0x40d   :  { %3303 = vmatpush1.bf16.msra.mxu1 %v4681_v34 }
 0x40e   :  { %3304 = vmatprep.subr.bf16.mxu1 %v4686_v35 }
 0x411   :  { %3305 = vmatpush1.bf16.msra.mxu1 %v4684_v36 }
 0x412   :  { %3306 = vmatprep.subr.bf16.mxu1 %v4689_v37 }
 0x415   :  { %3307 = vmatpush1.bf16.msra.mxu1 %v4687_v38 }
 0x416   :  { %3308 = vmatprep.subr.bf16.mxu1 %v4692_v40 }
 0x419   :  { %3309 = vmatpush1.bf16.msra.mxu1 %v4690_v41 }
 0x41a   :  { %3310 = vmatprep.subr.bf16.mxu1 %v4695_v42 }
 0x41d   :  { %3311 = vmatpush1.bf16.msra.mxu1 %v4693_v43 }
 0x41e   :  { %3312 = vmatprep.subr.bf16.mxu1 %v4698_v44 }
 0x421   :  { %3313 = vmatpush1.bf16.msra.mxu1 %v4696_v55 }
 0x422   :  { %3314 = vmatprep.subr.bf16.mxu1 %v4701_v47 }
 0x425   :  { %3315 = vmatpush1.bf16.msra.mxu1 %v4699_v57 }
 0x456   :  { %v2595_v53 = vpop.f32.mrb[4].mxu0 }
 0x457   :  { %v4048_v54 = vadd.f32 %v2595_v53, %v782_v51  ;;  %v2597_v56 = vpop.f32.mrb[5].mxu0 }
 0x458   :  { %v4049_v58 = vadd.f32 %v2597_v56, %v786_v52  ;;  %v2599_v59 = vpop.f32.mrb[6].mxu0 }
 0x459   :  { %4728 = vtanh.f32 %v4048_v54  ;;  %v2600_v60 = vpop.f32.mrb[7].mxu0 }
 0x45a   :  { %4730 = vtanh.f32 %v4049_v58 }
 0x463   :  { %v4729_v61 = vpop.eup %4728 }
 0x464   :  { %v4731_v46 = vpop.eup %4730  ;;  %v2612_v50 = vpack.c.bf16 %v4729_v61, %v4729_v61 }
 0x465   :  { %v2613_v62 = vpack.c.bf16 %v4731_v46, %v4731_v46 }
 0x467   :  { %3316 = vmatprep.mubr.bf16.mxu1 %v2613_v62 }
 0x468   :  { %3317 = vmatmul.mubr.bf16.vlgmr.msra.gmra.mrb[4].mxu1 %v2612_v50 }
 0x53b   :  { %v3318_v9 = vpop.f32.mrb[4].mxu1 }
 0x53c   :  { %v4050_v10 = vadd.f32 %v3318_v9, %v2715_v39  ;;  %v3320_v0 = vpop.f32.mrb[5].mxu1 }
 0x53d   :  { %v4051_v45 = vadd.f32 %v3320_v0, %v2719_v8  ;;  %v3322_v11 = vpop.f32.mrb[6].mxu1 }
 0x53e   :  { %v3325_v12 = vmax.f32 %v4050_v10, 0.0  ;;  %v3323_v13 = vpop.f32.mrb[7].mxu1 }
 0x53f   :  { %v3326_v14 = vmax.f32 %v4051_v45, 0.0 }
 0x540   :  { %v3327_v16 = vpack.c.bf16 %v3325_v12, %v3325_v12 }
 0x541   :  { %v3328_v15 = vpack.c.bf16 %v3326_v14, %v3326_v14 }
 0x543   :  { %3496 = vmatprep.mubr.bf16.mxu0 %v3328_v15 }
 0x544   :  { %3497 = vmatmul.mubr.bf16.vlgmr.msra.gmra.mrb[8].mxu0 %v3327_v16 }
 0x617   :  { %v4038_v17 = vpop.f32.mrb[8].mxu0 }
 0x618   :  { %v4039_v18 = vpop.f32.mrb[9].mxu0 }
 0x619   :  { %v4040_v5 = vadd.f32 %v4039_v18, %v4038_v17  ;;  %v4041_v4 = vpop.f32.mrb[10].mxu0 }
 0x61a   :  { %v4042_v7 = vpop.f32.mrb[11].mxu0 }
 0x61b   :  { %v3499_v20 = vadd.f32 %v4040_v5, %v3997_v19 }
 0x61d   :  { %3504 = vst [vmem:[#allocation18] sm:$0xff] %v3499_v20 }
 0x61e   :  { %4909 = shalt.err (!%p4906_p1)
}
 0x61f   :  { %s4910_s19 = scalar_lea.hbm %s5251_s9, 128 }
 0x620   :  { %p4911_p2 = scmp.ne.s32.totalorder %s5251_s9, %s4910_s19  ;;  %p4914_p3 = scmp.lt.u32.totalorder %s4910_s19, %s5251_s9 }
 0x622   :  { %p4916_p4 = pnand %p4914_p3, %p4911_p2 }
 0x624   :  { %4919 = shalt.err (!%p4916_p4)
}
 0x625   :  { %3514 = dma.vmem_to_hbm [thread:$0]  %s3512_s2, 128, %s5251_s9, [#allocation9]  }
 0x626   :  { %4944 = dma.done.wait [#allocation9], 128  }
 0x627   :  { %4945 = vsyncadd [#allocation9], 4294967168 }
 0x628   :  { %3518 = vsyncpa [#allocation8], 1 }
 0x629   :  { %3519 = vsyncpa [#allocation11], 1 }
 0x62a   :  { %3520 = vsyncpa [#allocation14], 1 }
 0x62b   :  { %3521 = vsyncpa [#allocation17], 1 }
 0x62c   :  { %3522 = vsyncpa [#allocation9], 1 }
 0x62d   :  { %3523 = vsyncmov [#allocation3] }
 0x630   :  { %s3524_s26 = vpop.sfrf %3523 }
 0x631   :  { %p4014_p5 = scmp.ne.s32.totalorder %s3524_s26, 0 }
 0x633   :  { %3528 = shalt.err (%p4014_p5)  }
 0x634   :  { %3530 = vsyncmov [#allocation3 + $0x1] }
 0x637   :  { %s3531_s0 = vpop.sfrf %3530 }
 0x638   :  { %p4015_p6 = scmp.ne.s32.totalorder %s3531_s0, 0 }
 0x63a   :  { %3535 = shalt.err (%p4015_p6)  }
 0x63b   :  { %3537 = vsyncmov [#allocation3 + $0x2] }
 0x63e   :  { %s3538_s27 = vpop.sfrf %3537 }
 0x63f   :  { %p4016_p7 = scmp.ne.s32.totalorder %s3538_s27, 0 }
 0x641   :  { %3542 = shalt.err (%p4016_p7)  }
 0x642   :  { %3544 = vsyncmov [#allocation3 + $0x3] }
 0x645   :  { %s3545_s9 = vpop.sfrf %3544 }
 0x646   :  { %p4017_p8 = scmp.ne.s32.totalorder %s3545_s9, 0 }
 0x648   :  { %3549 = shalt.err (%p4017_p8)  }
 0x649   :  { %3551 = vsyncmov [#allocation3 + $0x4] }
 0x64c   :  { %s3552_s28 = vpop.sfrf %3551 }
 0x64d   :  { %p4018_p9 = scmp.ne.s32.totalorder %s3552_s28, 0 }
 0x64f   :  { %3556 = shalt.err (%p4018_p9)  }
 0x650   :  { %3558 = vsyncmov [#allocation3 + $0x5] }
 0x653   :  { %s3559_s29 = vpop.sfrf %3558 }
 0x654   :  { %p4019_p10 = scmp.ne.s32.totalorder %s3559_s29, 0 }
 0x656   :  { %3563 = shalt.err (%p4019_p10)  }
 0x657   :  { %3565 = vsyncmov [#allocation3 + $0x6] }
 0x65a   :  { %s3566_s6 = vpop.sfrf %3565 }
 0x65b   :  { %p4020_p11 = scmp.ne.s32.totalorder %s3566_s6, 0 }
 0x65d   :  { %3570 = shalt.err (%p4020_p11)  }
 0x65e   :  { %3572 = vsyncmov [#allocation3 + $0x7] }
 0x661   :  { %s3573_s22 = vpop.sfrf %3572 }
 0x662   :  { %p4021_p12 = scmp.ne.s32.totalorder %s3573_s22, 0 }
 0x664   :  { %3577 = shalt.err (%p4021_p12)  }

</bundles_post_ra>
